<compile_context>
chip_gen: v7x
topology: tpu7x:2x2x1
jax: 0.10.0
libtpu: 0.0.40
codegen_flags: <defaults>
</compile_context>

<pallas_src>
import functools

import jax
import jax.numpy as jnp
from jax.experimental import pallas as pl
from jax.experimental.pallas import tpu as pltpu


def _round_up(x, m):
    return (x + m - 1) // m * m


def _mlp_kernel(x_ref, *refs, real_dims, ln, act, eps):
    """Fused n-layer MLP for one batch tile.

    x_ref       : (tm, dim_in)  activation tile at its real feature width
    refs layout : w_0..w_{L-1}  (K_l, N_l)  weights, zero-padded, pre-transposed
                  b_0..b_{L-1}  (1, N_l)    biases (zero in padded lanes)
                  g_0..g_{L-1}  (1, N_l)    LN gamma (zero in padded lanes)
                  bt_0..bt_{L-1}(1, N_l)    LN beta  (zero in padded lanes)
                  o_ref         (tm, N_{L-1})
    """
    n_layers = len(real_dims) - 1
    w_refs = refs[:n_layers]
    b_refs = refs[n_layers:2 * n_layers]
    g_refs = refs[2 * n_layers:3 * n_layers]
    bt_refs = refs[3 * n_layers:4 * n_layers]
    o_ref = refs[4 * n_layers]

    inv_sqrt2 = 0.7071067811865476
    h = x_ref[...]
    for l in range(n_layers):  # static unroll: n_layers is small & known
        do = real_dims[l + 1]          # real (unpadded) output width
        w = w_refs[l][...]
        Po = w.shape[1]                # lane-padded output width (mult of 128)
        # Native-dtype operands into the MXU, f32 accumulate.
        y = jnp.dot(h, w, preferred_element_type=jnp.float32)
        y = y + b_refs[l][...].astype(jnp.float32)
        if ln:
            # Two-pass LayerNorm (no E[y^2]-E[y]^2 cancellation). Padded lanes
            # of y are exactly 0, so sum(y) over Po lanes == sum over do lanes;
            # the centered term is masked so padded lanes don't pollute var.
            inv_do = 1.0 / do
            mean = jnp.sum(y, axis=-1, keepdims=True) * inv_do
            if Po == do:
                diff = y - mean
            else:
                lane = jax.lax.broadcasted_iota(jnp.int32, (1, Po), 1)
                diff = jnp.where(lane < do, y - mean, 0.0)
            var = jnp.sum(diff * diff, axis=-1, keepdims=True) * inv_do
            y = diff * jax.lax.rsqrt(var + eps)
            # gamma/beta are 0 in padded lanes -> padded lanes stay 0.
            y = y * g_refs[l][...].astype(jnp.float32) + bt_refs[l][...].astype(jnp.float32)
        if act == "gelu":
            # exact (erf) GELU == torch.nn.GELU() default
            y = 0.5 * y * (1.0 + jax.lax.erf(y * inv_sqrt2))
        else:  # relu
            y = jnp.maximum(y, 0.0)
        # gelu(0)=relu(0)=0 and next layer's padded weight rows are 0, so the
        # padded lanes never affect real outputs.
        h = y.astype(x_ref.dtype)
    o_ref[...] = h.astype(o_ref.dtype)


def pack_mlp_params(params, dim_in, dtype=jnp.float32):
    """Pad/transpose parameters ONCE (hoisted out of the per-call path).

    params: list of (w_t (di, do), b (do,), gamma (do,), beta (do,)).
    Layer 0 keeps its real K (= dim_in); later layers pad K to the previous
    layer's lane-padded width; every N is padded to a multiple of 128 lanes.
    """
    real_dims = [dim_in] + [w_t.shape[1] for (w_t, _, _, _) in params]
    w_p, b_p, g_p, bt_p = [], [], [], []
    for l, (w_t, b, gamma, beta) in enumerate(params):
        di, do = w_t.shape
        K = di if l == 0 else _round_up(di, 128)
        N = _round_up(do, 128)
        w_p.append(jnp.zeros((K, N), dtype).at[:di, :do].set(w_t.astype(dtype)))
        b_p.append(jnp.zeros((1, N), jnp.float32).at[0, :do].set(b.astype(jnp.float32)))
        g_p.append(jnp.zeros((1, N), jnp.float32).at[0, :do].set(gamma.astype(jnp.float32)))
        bt_p.append(jnp.zeros((1, N), jnp.float32).at[0, :do].set(beta.astype(jnp.float32)))
    return {"w": w_p, "b": b_p, "g": g_p, "bt": bt_p, "real_dims": tuple(real_dims)}


def mlp_forward(x, packed, *, ln, act, tm_max=512, eps=1e-5):
    """x: (M, dim_in). packed: output of pack_mlp_params."""
    M, dim_in = x.shape
    real_dims = packed["real_dims"]
    assert dim_in == real_dims[0]
    L = len(packed["w"])
    N_last = packed["w"][-1].shape[1]

    # Largest batch tile that still leaves >= 2 "parallel" grid tiles, so v7x's
    # two TensorCores both get work; multiple of 8 sublanes (use 16 for bf16).
    tm = min(tm_max, _round_up(max((M + 1) // 2, 8), 8))
    M_pad = _round_up(M, tm)
    xp = x if M_pad == M else jnp.zeros((M_pad, dim_in), x.dtype).at[:M].set(x)

    kernel = functools.partial(_mlp_kernel, real_dims=real_dims,
                               ln=ln, act=act, eps=eps)

    # Advisory cost estimate for XLA's scheduler around the custom call.
    flops = 2 * M_pad * sum(w.shape[0] * w.shape[1] for w in packed["w"])
    transcendentals = (M_pad * sum(w.shape[1] for w in packed["w"])) if act == "gelu" else 0
    param_bytes = sum(int(a.size) * a.dtype.itemsize
                      for a in packed["w"] + packed["b"] + packed["g"] + packed["bt"])
    bytes_accessed = (int(xp.size) * xp.dtype.itemsize + param_bytes
                      + M_pad * N_last * xp.dtype.itemsize)

    # Grid-invariant index maps keep every parameter VMEM-resident across all
    # batch tiles.  (Parameter footprint here is a few hundred KiB, far below
    # every generation's scoped-VMEM default, so no vmem_limit_bytes needed;
    # for large hidden dims, consider pipeline_mode=pl.Buffered(1) on these
    # invariant specs and an explicit vmem_limit_bytes.)
    in_specs = [pl.BlockSpec((tm, dim_in), lambda i: (i, 0))]     # activation tile
    for w in packed["w"]:
        in_specs.append(pl.BlockSpec(w.shape, lambda i: (0, 0)))  # weights, resident
    for group in (packed["b"], packed["g"], packed["bt"]):
        for a in group:
            in_specs.append(pl.BlockSpec(a.shape, lambda i: (0, 0)))

    out = pl.pallas_call(
        kernel,
        out_shape=jax.ShapeDtypeStruct((M_pad, N_last), x.dtype),
        grid_spec=pltpu.PrefetchScalarGridSpec(
            num_scalar_prefetch=0,
            grid=(M_pad // tm,),
            in_specs=in_specs,
            out_specs=pl.BlockSpec((tm, N_last), lambda i: (i, 0)),  # lane-dense
        ),
        compiler_params=pltpu.CompilerParams(
            dimension_semantics=("parallel",)),  # batch tiles -> both v7x TCs
        cost_estimate=pl.CostEstimate(flops=flops,
                                      transcendentals=transcendentals,
                                      bytes_accessed=bytes_accessed),
    )(xp, *packed["w"], *packed["b"], *packed["g"], *packed["bt"])
    return out[:M, :real_dims[-1]]


def init_mlp_params(key, dim_in, dim_out, dim_hidden, n_layers):
    """Deterministic params matching torch.nn.Linear/LayerNorm shapes."""
    params = []
    for l_idx in range(n_layers):
        di = dim_in if l_idx == 0 else dim_hidden
        do = dim_out if l_idx == n_layers - 1 else dim_hidden
        key, kw, kb = jax.random.split(key, 3)
        bound = 1.0 / (di ** 0.5)
        # torch Linear weight is (do, di); store transposed for x @ W
        w_t = jax.random.uniform(kw, (di, do), jnp.float32, -bound, bound)
        b = jax.random.uniform(kb, (do,), jnp.float32, -bound, bound)
        gamma = jnp.ones((do,), jnp.float32)
        beta = jnp.zeros((do,), jnp.float32)
        params.append((w_t, b, gamma, beta))
    return params


def mlp_reference(x, params, *, ln, act, eps=1e-5):
    """Pure-JAX reference matching the PyTorch module."""
    h = x
    for (w_t, b, gamma, beta) in params:
        y = h @ w_t + b
        if ln:
            mu = jnp.mean(y, axis=-1, keepdims=True)
            var = jnp.mean(jnp.square(y - mu), axis=-1, keepdims=True)
            y = (y - mu) * jax.lax.rsqrt(var + eps) * gamma + beta
        h = jax.nn.gelu(y, approximate=False) if act == "gelu" else jnp.maximum(y, 0.0)
    return h


if __name__ == "__main__":
    # MLP(dim_in=32, dim_out=16, dim_hidden=64, n_layers=3, act_fn='gelu', ln=True)
    dim_in, dim_out, dim_hidden, n_layers = 32, 16, 64, 3
    act, ln = "gelu", True
    batch = 256  # -> two 128-row "parallel" batch tiles (v7x megacore)

    key = jax.random.PRNGKey(0)
    key, kx = jax.random.split(key)
    x = jax.random.normal(kx, (batch, dim_in), jnp.float32)
    params = init_mlp_params(key, dim_in, dim_out, dim_hidden, n_layers)

    # Pack/pad parameters ONCE (not on the per-call path).
    packed = pack_mlp_params(params, dim_in, dtype=jnp.float32)

    out = mlp_forward(x, packed, ln=ln, act=act)
    jax.block_until_ready(out)

    ref = mlp_reference(x, params, ln=ln, act=act)
    assert out.shape == (batch, dim_out)
    assert jnp.allclose(out, ref, atol=5e-4, rtol=5e-4), \
        float(jnp.max(jnp.abs(out - ref)))

    print("KERNEL_OK")
</pallas_src>

<mosaic_0001>
module attributes {stable_mosaic.version = 11 : i64} {
  func.func @_mlp_kernel(%arg0: i32, %arg1: memref<128x32xf32, #tpu.memory_space<vmem>>, %arg2: memref<32x128xf32, #tpu.memory_space<vmem>>, %arg3: memref<128x128xf32, #tpu.memory_space<vmem>>, %arg4: memref<128x128xf32, #tpu.memory_space<vmem>>, %arg5: memref<1x128xf32, #tpu.memory_space<vmem>>, %arg6: memref<1x128xf32, #tpu.memory_space<vmem>>, %arg7: memref<1x128xf32, #tpu.memory_space<vmem>>, %arg8: memref<1x128xf32, #tpu.memory_space<vmem>>, %arg9: memref<1x128xf32, #tpu.memory_space<vmem>>, %arg10: memref<1x128xf32, #tpu.memory_space<vmem>>, %arg11: memref<1x128xf32, #tpu.memory_space<vmem>>, %arg12: memref<1x128xf32, #tpu.memory_space<vmem>>, %arg13: memref<1x128xf32, #tpu.memory_space<vmem>>, %arg14: memref<128x128xf32, #tpu.memory_space<vmem>>) attributes {dimension_semantics = [#tpu.dimension_semantics<parallel>], iteration_bounds = array<i64: 2>, scalar_prefetch = 0 : i64, scratch_operands = 0 : i64, tpu.core_type = #tpu.core_type<tc>, window_params = [{transform_indices = @transform_0, window_bounds = array<i64: 128, 32>}, {pipeline_mode = #tpu.pipeline_mode<synchronous>, transform_indices = @transform_1, window_bounds = array<i64: 32, 128>}, {pipeline_mode = #tpu.pipeline_mode<synchronous>, transform_indices = @transform_2, window_bounds = array<i64: 128, 128>}, {pipeline_mode = #tpu.pipeline_mode<synchronous>, transform_indices = @transform_3, window_bounds = array<i64: 128, 128>}, {pipeline_mode = #tpu.pipeline_mode<synchronous>, transform_indices = @transform_4, window_bounds = array<i64: 1, 128>}, {pipeline_mode = #tpu.pipeline_mode<synchronous>, transform_indices = @transform_5, window_bounds = array<i64: 1, 128>}, {pipeline_mode = #tpu.pipeline_mode<synchronous>, transform_indices = @transform_6, window_bounds = array<i64: 1, 128>}, {pipeline_mode = #tpu.pipeline_mode<synchronous>, transform_indices = @transform_7, window_bounds = array<i64: 1, 128>}, {pipeline_mode = #tpu.pipeline_mode<synchronous>, transform_indices = @transform_8, window_bounds = array<i64: 1, 128>}, {pipeline_mode = #tpu.pipeline_mode<synchronous>, transform_indices = @transform_9, window_bounds = array<i64: 1, 128>}, {pipeline_mode = #tpu.pipeline_mode<synchronous>, transform_indices = @transform_10, window_bounds = array<i64: 1, 128>}, {pipeline_mode = #tpu.pipeline_mode<synchronous>, transform_indices = @transform_11, window_bounds = array<i64: 1, 128>}, {pipeline_mode = #tpu.pipeline_mode<synchronous>, transform_indices = @transform_12, window_bounds = array<i64: 1, 128>}, {transform_indices = @transform_13, window_bounds = array<i64: 128, 128>}]} {
    %c0 = arith.constant 0 : index
    %c0_0 = arith.constant 0 : index
    %0 = vector.load %arg1[%c0, %c0_0] : memref<128x32xf32, #tpu.memory_space<vmem>>, vector<128x32xf32>
    %c0_1 = arith.constant 0 : index
    %c0_2 = arith.constant 0 : index
    %1 = vector.load %arg2[%c0_1, %c0_2] : memref<32x128xf32, #tpu.memory_space<vmem>>, vector<32x128xf32>
    %cst = arith.constant dense<0.000000e+00> : vector<128x128xf32>
    %2 = tpu.matmul %0, %1, %cst {dimension_numbers = #tpu.dot_dimension_numbers<[1], [0], [0], [1], [0, 0, 1, 1], [], []>} : vector<128x32xf32>, vector<32x128xf32>, vector<128x128xf32> -> vector<128x128xf32>
    %c0_3 = arith.constant 0 : index
    %c0_4 = arith.constant 0 : index
    %3 = vector.load %arg5[%c0_3, %c0_4] : memref<1x128xf32, #tpu.memory_space<vmem>>, vector<1x128xf32>
    %4 = vector.broadcast %3 : vector<1x128xf32> to vector<128x128xf32>
    %5 = arith.addf %2, %4 : vector<128x128xf32>
    %cst_5 = arith.constant dense<0.000000e+00> : vector<128xf32>
    %6 = vector.multi_reduction <add>, %5, %cst_5 [1] : vector<128x128xf32> to vector<128xf32>
    %7 = vector.shape_cast %6 : vector<128xf32> to vector<128x1xf32>
    %cst_6 = arith.constant 1.562500e-02 : f32
    %8 = vector.broadcast %cst_6 : f32 to vector<128x1xf32>
    %9 = arith.mulf %7, %8 : vector<128x1xf32>
    %10 = tpu.iota {dimensions = array<i32: 1>} : vector<1x128xi32>
    %c64_i32 = arith.constant 64 : i32
    %11 = vector.broadcast %c64_i32 : i32 to vector<1x128xi32>
    %12 = arith.cmpi slt, %10, %11 : vector<1x128xi32>
    %13 = vector.broadcast %9 : vector<128x1xf32> to vector<128x128xf32>
    %14 = arith.subf %5, %13 : vector<128x128xf32>
    %cst_7 = arith.constant 0.000000e+00 : f32
    %15 = vector.shape_cast %12 : vector<1x128xi1> to vector<1x128xi1>
    %16 = vector.broadcast %15 : vector<1x128xi1> to vector<128x128xi1>
    %17 = vector.broadcast %cst_7 : f32 to vector<128x128xf32>
    %18 = arith.select %16, %14, %17 : vector<128x128xi1>, vector<128x128xf32>
    %19 = arith.mulf %18, %18 : vector<128x128xf32>
    %cst_8 = arith.constant dense<0.000000e+00> : vector<128xf32>
    %20 = vector.multi_reduction <add>, %19, %cst_8 [1] : vector<128x128xf32> to vector<128xf32>
    %21 = vector.shape_cast %20 : vector<128xf32> to vector<128x1xf32>
    %cst_9 = arith.constant 1.562500e-02 : f32
    %22 = vector.broadcast %cst_9 : f32 to vector<128x1xf32>
    %23 = arith.mulf %21, %22 : vector<128x1xf32>
    %cst_10 = arith.constant 9.99999974E-6 : f32
    %24 = vector.broadcast %cst_10 : f32 to vector<128x1xf32>
    %25 = arith.addf %23, %24 : vector<128x1xf32>
    %26 = math.rsqrt %25 : vector<128x1xf32>
    %27 = vector.broadcast %26 : vector<128x1xf32> to vector<128x128xf32>
    %28 = arith.mulf %18, %27 : vector<128x128xf32>
    %c0_11 = arith.constant 0 : index
    %c0_12 = arith.constant 0 : index
    %29 = vector.load %arg8[%c0_11, %c0_12] : memref<1x128xf32, #tpu.memory_space<vmem>>, vector<1x128xf32>
    %30 = vector.broadcast %29 : vector<1x128xf32> to vector<128x128xf32>
    %31 = arith.mulf %28, %30 : vector<128x128xf32>
    %c0_13 = arith.constant 0 : index
    %c0_14 = arith.constant 0 : index
    %32 = vector.load %arg11[%c0_13, %c0_14] : memref<1x128xf32, #tpu.memory_space<vmem>>, vector<1x128xf32>
    %33 = vector.broadcast %32 : vector<1x128xf32> to vector<128x128xf32>
    %34 = arith.addf %31, %33 : vector<128x128xf32>
    %cst_15 = arith.constant 5.000000e-01 : f32
    %35 = vector.broadcast %cst_15 : f32 to vector<128x128xf32>
    %36 = arith.mulf %35, %34 : vector<128x128xf32>
    %cst_16 = arith.constant 0.707106769 : f32
    %37 = vector.broadcast %cst_16 : f32 to vector<128x128xf32>
    %38 = arith.mulf %34, %37 : vector<128x128xf32>
    %39 = math.erf %38 : vector<128x128xf32>
    %cst_17 = arith.constant 1.000000e+00 : f32
    %40 = vector.broadcast %cst_17 : f32 to vector<128x128xf32>
    %41 = arith.addf %40, %39 : vector<128x128xf32>
    %42 = arith.mulf %36, %41 : vector<128x128xf32>
    %c0_18 = arith.constant 0 : index
    %c0_19 = arith.constant 0 : index
    %43 = vector.load %arg3[%c0_18, %c0_19] : memref<128x128xf32, #tpu.memory_space<vmem>>, vector<128x128xf32>
    %cst_20 = arith.constant dense<0.000000e+00> : vector<128x128xf32>
    %44 = tpu.matmul %42, %43, %cst_20 {dimension_numbers = #tpu.dot_dimension_numbers<[1], [0], [0], [1], [0, 0, 1, 1], [], []>} : vector<128x128xf32>, vector<128x128xf32>, vector<128x128xf32> -> vector<128x128xf32>
    %c0_21 = arith.constant 0 : index
    %c0_22 = arith.constant 0 : index
    %45 = vector.load %arg6[%c0_21, %c0_22] : memref<1x128xf32, #tpu.memory_space<vmem>>, vector<1x128xf32>
    %46 = vector.broadcast %45 : vector<1x128xf32> to vector<128x128xf32>
    %47 = arith.addf %44, %46 : vector<128x128xf32>
    %cst_23 = arith.constant dense<0.000000e+00> : vector<128xf32>
    %48 = vector.multi_reduction <add>, %47, %cst_23 [1] : vector<128x128xf32> to vector<128xf32>
    %49 = vector.shape_cast %48 : vector<128xf32> to vector<128x1xf32>
    %cst_24 = arith.constant 1.562500e-02 : f32
    %50 = vector.broadcast %cst_24 : f32 to vector<128x1xf32>
    %51 = arith.mulf %49, %50 : vector<128x1xf32>
    %52 = tpu.iota {dimensions = array<i32: 1>} : vector<1x128xi32>
    %c64_i32_25 = arith.constant 64 : i32
    %53 = vector.broadcast %c64_i32_25 : i32 to vector<1x128xi32>
    %54 = arith.cmpi slt, %52, %53 : vector<1x128xi32>
    %55 = vector.broadcast %51 : vector<128x1xf32> to vector<128x128xf32>
    %56 = arith.subf %47, %55 : vector<128x128xf32>
    %cst_26 = arith.constant 0.000000e+00 : f32
    %57 = vector.shape_cast %54 : vector<1x128xi1> to vector<1x128xi1>
    %58 = vector.broadcast %57 : vector<1x128xi1> to vector<128x128xi1>
    %59 = vector.broadcast %cst_26 : f32 to vector<128x128xf32>
    %60 = arith.select %58, %56, %59 : vector<128x128xi1>, vector<128x128xf32>
    %61 = arith.mulf %60, %60 : vector<128x128xf32>
    %cst_27 = arith.constant dense<0.000000e+00> : vector<128xf32>
    %62 = vector.multi_reduction <add>, %61, %cst_27 [1] : vector<128x128xf32> to vector<128xf32>
    %63 = vector.shape_cast %62 : vector<128xf32> to vector<128x1xf32>
    %cst_28 = arith.constant 1.562500e-02 : f32
    %64 = vector.broadcast %cst_28 : f32 to vector<128x1xf32>
    %65 = arith.mulf %63, %64 : vector<128x1xf32>
    %cst_29 = arith.constant 9.99999974E-6 : f32
    %66 = vector.broadcast %cst_29 : f32 to vector<128x1xf32>
    %67 = arith.addf %65, %66 : vector<128x1xf32>
    %68 = math.rsqrt %67 : vector<128x1xf32>
    %69 = vector.broadcast %68 : vector<128x1xf32> to vector<128x128xf32>
    %70 = arith.mulf %60, %69 : vector<128x128xf32>
    %c0_30 = arith.constant 0 : index
    %c0_31 = arith.constant 0 : index
    %71 = vector.load %arg9[%c0_30, %c0_31] : memref<1x128xf32, #tpu.memory_space<vmem>>, vector<1x128xf32>
    %72 = vector.broadcast %71 : vector<1x128xf32> to vector<128x128xf32>
    %73 = arith.mulf %70, %72 : vector<128x128xf32>
    %c0_32 = arith.constant 0 : index
    %c0_33 = arith.constant 0 : index
    %74 = vector.load %arg12[%c0_32, %c0_33] : memref<1x128xf32, #tpu.memory_space<vmem>>, vector<1x128xf32>
    %75 = vector.broadcast %74 : vector<1x128xf32> to vector<128x128xf32>
    %76 = arith.addf %73, %75 : vector<128x128xf32>
    %cst_34 = arith.constant 5.000000e-01 : f32
    %77 = vector.broadcast %cst_34 : f32 to vector<128x128xf32>
    %78 = arith.mulf %77, %76 : vector<128x128xf32>
    %cst_35 = arith.constant 0.707106769 : f32
    %79 = vector.broadcast %cst_35 : f32 to vector<128x128xf32>
    %80 = arith.mulf %76, %79 : vector<128x128xf32>
    %81 = math.erf %80 : vector<128x128xf32>
    %cst_36 = arith.constant 1.000000e+00 : f32
    %82 = vector.broadcast %cst_36 : f32 to vector<128x128xf32>
    %83 = arith.addf %82, %81 : vector<128x128xf32>
    %84 = arith.mulf %78, %83 : vector<128x128xf32>
    %c0_37 = arith.constant 0 : index
    %c0_38 = arith.constant 0 : index
    %85 = vector.load %arg4[%c0_37, %c0_38] : memref<128x128xf32, #tpu.memory_space<vmem>>, vector<128x128xf32>
    %cst_39 = arith.constant dense<0.000000e+00> : vector<128x128xf32>
    %86 = tpu.matmul %84, %85, %cst_39 {dimension_numbers = #tpu.dot_dimension_numbers<[1], [0], [0], [1], [0, 0, 1, 1], [], []>} : vector<128x128xf32>, vector<128x128xf32>, vector<128x128xf32> -> vector<128x128xf32>
    %c0_40 = arith.constant 0 : index
    %c0_41 = arith.constant 0 : index
    %87 = vector.load %arg7[%c0_40, %c0_41] : memref<1x128xf32, #tpu.memory_space<vmem>>, vector<1x128xf32>
    %88 = vector.broadcast %87 : vector<1x128xf32> to vector<128x128xf32>
    %89 = arith.addf %86, %88 : vector<128x128xf32>
    %cst_42 = arith.constant dense<0.000000e+00> : vector<128xf32>
    %90 = vector.multi_reduction <add>, %89, %cst_42 [1] : vector<128x128xf32> to vector<128xf32>
    %91 = vector.shape_cast %90 : vector<128xf32> to vector<128x1xf32>
    %cst_43 = arith.constant 6.250000e-02 : f32
    %92 = vector.broadcast %cst_43 : f32 to vector<128x1xf32>
    %93 = arith.mulf %91, %92 : vector<128x1xf32>
    %94 = tpu.iota {dimensions = array<i32: 1>} : vector<1x128xi32>
    %c16_i32 = arith.constant 16 : i32
    %95 = vector.broadcast %c16_i32 : i32 to vector<1x128xi32>
    %96 = arith.cmpi slt, %94, %95 : vector<1x128xi32>
    %97 = vector.broadcast %93 : vector<128x1xf32> to vector<128x128xf32>
    %98 = arith.subf %89, %97 : vector<128x128xf32>
    %cst_44 = arith.constant 0.000000e+00 : f32
    %99 = vector.shape_cast %96 : vector<1x128xi1> to vector<1x128xi1>
    %100 = vector.broadcast %99 : vector<1x128xi1> to vector<128x128xi1>
    %101 = vector.broadcast %cst_44 : f32 to vector<128x128xf32>
    %102 = arith.select %100, %98, %101 : vector<128x128xi1>, vector<128x128xf32>
    %103 = arith.mulf %102, %102 : vector<128x128xf32>
    %cst_45 = arith.constant dense<0.000000e+00> : vector<128xf32>
    %104 = vector.multi_reduction <add>, %103, %cst_45 [1] : vector<128x128xf32> to vector<128xf32>
    %105 = vector.shape_cast %104 : vector<128xf32> to vector<128x1xf32>
    %cst_46 = arith.constant 6.250000e-02 : f32
    %106 = vector.broadcast %cst_46 : f32 to vector<128x1xf32>
    %107 = arith.mulf %105, %106 : vector<128x1xf32>
    %cst_47 = arith.constant 9.99999974E-6 : f32
    %108 = vector.broadcast %cst_47 : f32 to vector<128x1xf32>
    %109 = arith.addf %107, %108 : vector<128x1xf32>
    %110 = math.rsqrt %109 : vector<128x1xf32>
    %111 = vector.broadcast %110 : vector<128x1xf32> to vector<128x128xf32>
    %112 = arith.mulf %102, %111 : vector<128x128xf32>
    %c0_48 = arith.constant 0 : index
    %c0_49 = arith.constant 0 : index
    %113 = vector.load %arg10[%c0_48, %c0_49] : memref<1x128xf32, #tpu.memory_space<vmem>>, vector<1x128xf32>
    %114 = vector.broadcast %113 : vector<1x128xf32> to vector<128x128xf32>
    %115 = arith.mulf %112, %114 : vector<128x128xf32>
    %c0_50 = arith.constant 0 : index
    %c0_51 = arith.constant 0 : index
    %116 = vector.load %arg13[%c0_50, %c0_51] : memref<1x128xf32, #tpu.memory_space<vmem>>, vector<1x128xf32>
    %117 = vector.broadcast %116 : vector<1x128xf32> to vector<128x128xf32>
    %118 = arith.addf %115, %117 : vector<128x128xf32>
    %cst_52 = arith.constant 5.000000e-01 : f32
    %119 = vector.broadcast %cst_52 : f32 to vector<128x128xf32>
    %120 = arith.mulf %119, %118 : vector<128x128xf32>
    %cst_53 = arith.constant 0.707106769 : f32
    %121 = vector.broadcast %cst_53 : f32 to vector<128x128xf32>
    %122 = arith.mulf %118, %121 : vector<128x128xf32>
    %123 = math.erf %122 : vector<128x128xf32>
    %cst_54 = arith.constant 1.000000e+00 : f32
    %124 = vector.broadcast %cst_54 : f32 to vector<128x128xf32>
    %125 = arith.addf %124, %123 : vector<128x128xf32>
    %126 = arith.mulf %120, %125 : vector<128x128xf32>
    %c0_55 = arith.constant 0 : index
    %c0_56 = arith.constant 0 : index
    %127 = vector.load %arg14[%c0_55, %c0_56] : memref<128x128xf32, #tpu.memory_space<vmem>>, vector<128x128xf32>
    tpu.vector_store %arg14[%c0_55, %c0_56], %126 {strides = array<i32>} : memref<128x128xf32, #tpu.memory_space<vmem>>, vector<128x128xf32>,
    return
  }
  func.func @transform_0(%arg0: i32) -> (i32, i32) {
    %c0_i32 = arith.constant 0 : i32
    %c0_i32_0 = arith.constant 0 : i32
    return %arg0, %c0_i32 : i32, i32
  }
  func.func @transform_1(%arg0: i32) -> (i32, i32) {
    %c0_i32 = arith.constant 0 : i32
    %c0_i32_0 = arith.constant 0 : i32
    %c0_i32_1 = arith.constant 0 : i32
    return %c0_i32, %c0_i32_0 : i32, i32
  }
  func.func @transform_2(%arg0: i32) -> (i32, i32) {
    %c0_i32 = arith.constant 0 : i32
    %c0_i32_0 = arith.constant 0 : i32
    %c0_i32_1 = arith.constant 0 : i32
    return %c0_i32, %c0_i32_0 : i32, i32
  }
  func.func @transform_3(%arg0: i32) -> (i32, i32) {
    %c0_i32 = arith.constant 0 : i32
    %c0_i32_0 = arith.constant 0 : i32
    %c0_i32_1 = arith.constant 0 : i32
    return %c0_i32, %c0_i32_0 : i32, i32
  }
  func.func @transform_4(%arg0: i32) -> (i32, i32) {
    %c0_i32 = arith.constant 0 : i32
    %c0_i32_0 = arith.constant 0 : i32
    %c0_i32_1 = arith.constant 0 : i32
    return %c0_i32, %c0_i32_0 : i32, i32
  }
  func.func @transform_5(%arg0: i32) -> (i32, i32) {
    %c0_i32 = arith.constant 0 : i32
    %c0_i32_0 = arith.constant 0 : i32
    %c0_i32_1 = arith.constant 0 : i32
    return %c0_i32, %c0_i32_0 : i32, i32
  }
  func.func @transform_6(%arg0: i32) -> (i32, i32) {
    %c0_i32 = arith.constant 0 : i32
    %c0_i32_0 = arith.constant 0 : i32
    %c0_i32_1 = arith.constant 0 : i32
    return %c0_i32, %c0_i32_0 : i32, i32
  }
  func.func @transform_7(%arg0: i32) -> (i32, i32) {
    %c0_i32 = arith.constant 0 : i32
    %c0_i32_0 = arith.constant 0 : i32
    %c0_i32_1 = arith.constant 0 : i32
    return %c0_i32, %c0_i32_0 : i32, i32
  }
  func.func @transform_8(%arg0: i32) -> (i32, i32) {
    %c0_i32 = arith.constant 0 : i32
    %c0_i32_0 = arith.constant 0 : i32
    %c0_i32_1 = arith.constant 0 : i32
    return %c0_i32, %c0_i32_0 : i32, i32
  }
  func.func @transform_9(%arg0: i32) -> (i32, i32) {
    %c0_i32 = arith.constant 0 : i32
    %c0_i32_0 = arith.constant 0 : i32
    %c0_i32_1 = arith.constant 0 : i32
    return %c0_i32, %c0_i32_0 : i32, i32
  }
  func.func @transform_10(%arg0: i32) -> (i32, i32) {
    %c0_i32 = arith.constant 0 : i32
    %c0_i32_0 = arith.constant 0 : i32
    %c0_i32_1 = arith.constant 0 : i32
    return %c0_i32, %c0_i32_0 : i32, i32
  }
  func.func @transform_11(%arg0: i32) -> (i32, i32) {
    %c0_i32 = arith.constant 0 : i32
    %c0_i32_0 = arith.constant 0 : i32
    %c0_i32_1 = arith.constant 0 : i32
    return %c0_i32, %c0_i32_0 : i32, i32
  }
  func.func @transform_12(%arg0: i32) -> (i32, i32) {
    %c0_i32 = arith.constant 0 : i32
    %c0_i32_0 = arith.constant 0 : i32
    %c0_i32_1 = arith.constant 0 : i32
    return %c0_i32, %c0_i32_0 : i32, i32
  }
  func.func @transform_13(%arg0: i32) -> (i32, i32) {
    %c0_i32 = arith.constant 0 : i32
    %c0_i32_0 = arith.constant 0 : i32
    return %arg0, %c0_i32 : i32, i32
  }
}

</mosaic_0001>

<bundles_post_ra>
// kernel: tpu_custom_call.1
= control target key start
LH: loop header
LB: loop body
LE: loop exit
PB: predicated region body
PF: predicated region fallthrough
CT: control target
= control target key end

     0   :  { %s3770_s0 = inlined_call_operand.vmem [shape: f32[256,32], index: 0, kind: input, shape index: {}]   ;;  %s3771_s1 = inlined_call_operand.vmem [shape: f32[32,128], index: 1, kind: input, shape index: {}]   ;;  %s3772_s2 = inlined_call_operand.vmem [shape: f32[128,128], index: 2, kind: input, shape index: {}]   ;;  %s3773_s3 = inlined_call_operand.vmem [shape: f32[128,128], index: 3, kind: input, shape index: {}]   ;;  %s3774_s4 = inlined_call_operand.vmem [shape: f32[1,128], index: 4, kind: input, shape index: {}]   ;;  %s3775_s5 = inlined_call_operand.vmem [shape: f32[1,128], index: 5, kind: input, shape index: {}]   ;;  %s3776_s6 = inlined_call_operand.vmem [shape: f32[1,128], index: 6, kind: input, shape index: {}]   ;;  %s3777_s7 = inlined_call_operand.vmem [shape: f32[1,128], index: 7, kind: input, shape index: {}]   ;;  %s3778_s8 = inlined_call_operand.vmem [shape: f32[1,128], index: 8, kind: input, shape index: {}]   ;;  %s3779_s9 = inlined_call_operand.vmem [shape: f32[1,128], index: 9, kind: input, shape index: {}]   ;;  %s3780_s10 = inlined_call_operand.vmem [shape: f32[1,128], index: 10, kind: input, shape index: {}]   ;;  %s3781_s11 = inlined_call_operand.vmem [shape: f32[1,128], index: 11, kind: input, shape index: {}]   ;;  %s3782_s12 = inlined_call_operand.vmem [shape: f32[1,128], index: 12, kind: input, shape index: {}]   ;;  %s3783_s13 = inlined_call_operand.hbm [shape: f32[256,128], index: 13, kind: output, shape index: {}]  }
   0x1   :  { %3784 = sst [smem:[#allocation6_spill]] %s3770_s0 }
   0x2   :  { %18 = vsyncpa [#allocation3], 0 }
   0x3   :  { %20 = vsyncpa [#allocation3 + $0x1], 0  ;;  %s2777_s25 = smov 0   ;;  %s2779_s26 = smov 0  }
   0x4   :  { %s2781_s27 = smov 0   ;;  %s2783_s28 = smov 0  }
   0x5 LB: > { %s2798_s29 = sadd.s32 4294967295, %s2702_s28   ;;  %s2053_s30 = sadd.s32 4294967294, %s2702_s28   ;;  %s2702_s28 = sphi %s2783_s28, %s3793_s28   ;;  %s2698_s27 = sphi %s2781_s27, %s3792_s27   ;;  %s2694_s26 = sphi %s2779_s26, %s3791_s26   ;;  %s2690_s25 = sphi %s2777_s25, %s3790_s25  }
   0x6   : > { %s2802_s14 = sadd.s32 1, %s2702_s28   ;;  %s311_s15 = sadd.s32 1, %s2698_s27 }
   0x7   : > { %s308_s16 = ssub.s32 %s2702_s28, %s2802_s14  ;;  %p321_p0 = scmp.ne.s32.totalorder %s2698_s27, %s2694_s26 }
   0x8   : > { %p309_p1 = scmp.eq.s32.totalorder %s308_s16, 0  ;;  %p322_p2 = scmp.eq.s32.totalorder %s2798_s29, 1 }
   0x9   : > { %p327_p3 = scmp.ne.s32.totalorder %s2694_s26, %s2690_s25  ;;  %p328_p4 = scmp.eq.s32.totalorder %s2053_s30, 1 }
   0xa   : > { %s2813_s17 = scalar_select %p309_p1, %s2698_s27, %s311_s15  }
   0xb   : > { %p2815_p5 = por %p322_p2, %p321_p0  ;;  %p2819_p6 = por %p328_p4, %p327_p3 }
   0xc   : > { %3785 = sst [smem:[#allocation5_spill]] %s2813_s17  ;;  %p2056_p7 = scmp.ge.s32.totalorder %s2702_s28, 1 }
   0xd   : > { %p391_p8 = scmp.lt.s32.totalorder %s2702_s28, 3 }
   0xf   : > { %p392_p9 = pnand %p2056_p7, %p391_p8 }
  0x10   : > { %v458_v0 = vld [vmem:[%s3771_s1] sm:$0xff] (!%p392_p9)  ;;  %v459_v1 = vld [vmem:[%s3771_s1 + $0x8] sm:$0xff] (!%p392_p9)  ;;  %v460_v2 = vld [vmem:[%s3771_s1 + $0x10] sm:$0xff] (!%p392_p9)  ;;  %s2058_s15 = sshll.u32 (!%p392_p9), %s2798_s29, 4  ;;  %vm469_vm0 = vcmask (!%p392_p9), 261120   ;;  %s3788_s0 = sld [smem:[#allocation6_spill]] (!%p392_p9)  ;;  %v711_v55 = vlaneseq (!%p392_p9) }
  0x11   : > { %395 = sbr.rel (%p392_p9) target bundleno = 1723 (0x6bb), region = 72  ;;  %v2319_v3 = vpack.c.bf16 (!%p392_p9), %v459_v1, %v458_v0  ;;  %v461_v4 = vld [vmem:[%s3771_s1 + $0x18] sm:$0xff] (!%p392_p9)  ;;  %p436_p10 = scmp.lt.s32.totalorder (!%p392_p9), %s2058_s15, 31  ;;  %v2060_v22 = vld [vmem:[%s3774_s4] ss:$0 sm:$0xff] (!%p392_p9) }
  0x12   : > { %v2323_v5 = vpack.c.bf16 (!%p392_p9), %v461_v4, %v460_v2  ;;  %v2920_v56 = vand.u32 (!%p392_p9), 127, %v711_v55  ;;  %s432_s24 = sand.u32 (!%p392_p9), 1, %s2694_s26   ;;  %s2090_s16 = sshll.u32 (!%p392_p9), %s2798_s29, 11 }
  0x13   : > { %2320 = vmatprep.subr.bf16.mxu0 (!%p392_p9), %v2319_v3  ;;  %s3659_s30 = sshll.u32 (!%p392_p9), %s432_s24, 7  ;;  %s3729_s17 = scalar_lea.sflag (!%p392_p9), [#allocation3], %s432_s24 }
  0x14   : > { %2322 = vmatpush3.bf16.msra.mxu0 (!%p392_p9), %v2319_v3  ;;  %vm713_vm1 = vcmp.lt.s32.totalorder (!%p392_p9), %v2920_v56, 64  ;;  %vm1688_vm2 = vcmp.lt.s32.totalorder (!%p392_p9), %v2920_v56, 16 }
  0x15   : > { %2324 = vmatprep.subr.bf16.mxu0 (!%p392_p9), %v2323_v5 }
  0x18   : > { %s3795_s15 = smov (!%p436_p10, %s2058_s15), 31  ;;  %2326 = vmatpush3.bf16.msra.mxu0 %v2323_v5 }
  0x19   : > { %s2059_s20 = sshll.u32 %s3795_s15, 3  ;;  %s3674_s15 = scalar_lea.vmem [#allocation2], %s3659_s30 }
  0x1a   : > { %s2841_s23 = scalar_lea.vmem %s3788_s0, %s2059_s20  ;;  %s1991_s20 = sshll.u32 %s3674_s15, 4  ;;  %s3724_s20 = int_to_ptr.vmem [resolvable:$true] %s1991_s20 }
  0x1b   : > { %v442_v6 = vld [vmem:[%s2841_s23] sm:$0xff]  ;;  %v443_v7 = vld [vmem:[%s2841_s23 + $0x8] sm:$0xff]  ;;  %v444_v8 = vld [vmem:[%s2841_s23 + $0x10] sm:$0xff]  ;;  %s2640_s29 = scalar_lea.vmem %s3724_s20, 2048  ;;  %s2704_s30 = smov [#allocation2]  }
  0x1c   : > { %2183 = vmatprep.mubr.msk.f32.mxu0 %vm469_vm0, %v442_v6  ;;  %v445_v9 = vld [vmem:[%s2841_s23 + $0x18] sm:$0xff]  ;;  %v446_v10 = vld [vmem:[%s2841_s23 + $0x20] sm:$0xff]  ;;  %v447_v11 = vld [vmem:[%s2841_s23 + $0x28] sm:$0xff]  ;;  %p2641_p11 = scmp.ne.s32.totalorder %s3724_s20, %s2640_s29  ;;  %s2644_s0 = sshll.u32 %s2704_s30, 4  ;;  %s2645_s0 = int_to_ptr.vmem [resolvable:$false] %s2644_s0 }
  0x1d   : > { %2184 = vmatmul.mubr.msk.f32.vlgmr.msra.gmra.mrb[0].mxu0 %vm469_vm0, %v443_v7  ;;  %v448_v12 = vld [vmem:[%s2841_s23 + $0x30] sm:$0xff]  ;;  %v449_v13 = vld [vmem:[%s2841_s23 + $0x38] sm:$0xff]  ;;  %v450_v14 = vld [vmem:[%s2841_s23 + $0x40] sm:$0xff]  ;;  %p2647_p0 = scmp.lt.s32.totalorder %s3724_s20, %s2645_s0 }
  0x1e   : > { %2186 = vmatprep.mubr.msk.f32.mxu0 %vm469_vm0, %v444_v8  ;;  %v451_v15 = vld [vmem:[%s2841_s23 + $0x48] sm:$0xff]  ;;  %v452_v16 = vld [vmem:[%s2841_s23 + $0x50] sm:$0xff]  ;;  %v453_v17 = vld [vmem:[%s2841_s23 + $0x58] sm:$0xff]  ;;  %p2642_p12 = pnand %p2641_p11, %p2815_p5 }
  0x1f   : > { %v454_v18 = vld [vmem:[%s2841_s23 + $0x60] sm:$0xff]  ;;  %v455_v19 = vld [vmem:[%s2841_s23 + $0x68] sm:$0xff]  ;;  %v456_v20 = vld [vmem:[%s2841_s23 + $0x70] sm:$0xff] }
  0x20   : > { %v457_v21 = vld [vmem:[%s2841_s23 + $0x78] sm:$0xff]  ;;  %s3722_s23 = scalar_lea.hbm %s3783_s13, %s2090_s16  ;;  %p2643_p13 = pneg %p2642_p12 }
  0x21   : > { %2187 = vmatmul.mubr.msk.f32.gmra.mrb[2].mxu0 %vm469_vm0, %v445_v9  ;;  %s2646_s16 = scalar_lea.vmem %s2645_s0, 4096 }
  0x22   : > { %2189 = vmatprep.mubr.msk.f32.mxu0 %vm469_vm0, %v446_v10  ;;  %p2648_p1 = scmp.lt.s32.totalorder %s2646_s16, %s2640_s29 }
  0x24   : > { %p2649_p2 = por %p2648_p1, %p2647_p0 }
  0x25   : > { %2190 = vmatmul.mubr.msk.f32.gmra.mrb[4].mxu0 %vm469_vm0, %v447_v11 }
  0x26   : > { %2192 = vmatprep.mubr.msk.f32.mxu0 %vm469_vm0, %v448_v12  ;;  %p2650_p3 = pnand %p2649_p2, %p2643_p13 }
  0x29   : > { %2193 = vmatmul.mubr.msk.f32.gmra.mrb[6].mxu0 %vm469_vm0, %v449_v13 }
  0x2a   : > { %2195 = vmatprep.mubr.msk.f32.mxu0 %vm469_vm0, %v450_v14 }
  0x2d   : > { %2196 = vmatmul.mubr.msk.f32.gmra.mrb[8].mxu0 %vm469_vm0, %v451_v15 }
  0x2e   : > { %2198 = vmatprep.mubr.msk.f32.mxu0 %vm469_vm0, %v452_v16 }
  0x31   : > { %2199 = vmatmul.mubr.msk.f32.gmra.mrb[10].mxu0 %vm469_vm0, %v453_v17 }
  0x32   : > { %2201 = vmatprep.mubr.msk.f32.mxu0 %vm469_vm0, %v454_v18 }
  0x35   : > { %2202 = vmatmul.mubr.msk.f32.gmra.mrb[12].mxu0 %vm469_vm0, %v455_v19 }
  0x36   : > { %2204 = vmatprep.mubr.msk.f32.mxu0 %vm469_vm0, %v456_v20 }
  0x39   : > { %2205 = vmatmul.mubr.msk.f32.gmra.mrb[14].mxu0 %vm469_vm0, %v457_v21 }
  0xf0   : > { %v2185_v23 = vpop.f32.mrb[0].mxu0 }
  0xf1   : > { %v584_v24 = vpop.f32.mrb[1].mxu0  ;;  %v2878_v28 = vadd.f32 %v2185_v23, %v2060_v22 }
  0xf2   : > { %v585_v25 = vadd.f32 %v2060_v22, %v584_v24 }
  0xf4   : > { %v2188_v26 = vpop.f32.mrb[2].mxu0  ;;  %663 = vadd.xlane.f32.xlu0 %v585_v25 }
  0xf5   : > { %v594_v27 = vpop.f32.mrb[3].mxu0  ;;  %v2881_v32 = vadd.f32 %v2188_v26, %v2060_v22 }
  0xf6   : > { %v595_v29 = vadd.f32 %v2060_v22, %v594_v27 }
  0xf8   : > { %v2191_v30 = vpop.f32.mrb[4].mxu0  ;;  %667 = vadd.xlane.f32.xlu1 %v595_v29  ;;  %665 = vadd.xlane.f32.xlu0 %v2878_v28 }
  0xf9   : > { %v604_v31 = vpop.f32.mrb[5].mxu0  ;;  %v2887_v36 = vadd.f32 %v2191_v30, %v2060_v22 }
  0xfa   : > { %v2883_v33 = vadd.f32 %v2060_v22, %v604_v31 }
  0xfc   : > { %v2194_v34 = vpop.f32.mrb[6].mxu0  ;;  %669 = vadd.xlane.f32.xlu1 %v2881_v32  ;;  %671 = vadd.xlane.f32.xlu0 %v2883_v33 }
  0xfd   : > { %v614_v35 = vpop.f32.mrb[7].mxu0  ;;  %v2893_v40 = vadd.f32 %v2194_v34, %v2060_v22 }
  0xfe   : > { %v2889_v37 = vadd.f32 %v2060_v22, %v614_v35 }
 0x100   : > { %v2197_v38 = vpop.f32.mrb[8].mxu0  ;;  %673 = vadd.xlane.f32.xlu1 %v2887_v36  ;;  %675 = vadd.xlane.f32.xlu0 %v2889_v37 }
 0x101   : > { %v624_v39 = vpop.f32.mrb[9].mxu0  ;;  %v2899_v44 = vadd.f32 %v2197_v38, %v2060_v22 }
 0x102   : > { %v2895_v41 = vadd.f32 %v2060_v22, %v624_v39 }
 0x104   : > { %v2200_v42 = vpop.f32.mrb[10].mxu0  ;;  %677 = vadd.xlane.f32.xlu1 %v2893_v40  ;;  %679 = vadd.xlane.f32.xlu0 %v2895_v41 }
 0x105   : > { %v634_v43 = vpop.f32.mrb[11].mxu0  ;;  %v2905_v48 = vadd.f32 %v2200_v42, %v2060_v22 }
 0x106   : > { %v2901_v45 = vadd.f32 %v2060_v22, %v634_v43 }
 0x108   : > { %v2203_v46 = vpop.f32.mrb[12].mxu0  ;;  %681 = vadd.xlane.f32.xlu1 %v2899_v44  ;;  %683 = vadd.xlane.f32.xlu0 %v2901_v45 }
 0x109   : > { %v644_v47 = vpop.f32.mrb[13].mxu0  ;;  %v2911_v52 = vadd.f32 %v2203_v46, %v2060_v22 }
 0x10a   : > { %v2907_v49 = vadd.f32 %v2060_v22, %v644_v47 }
 0x10c   : > { %v2206_v50 = vpop.f32.mrb[14].mxu0  ;;  %685 = vadd.xlane.f32.xlu1 %v2905_v48  ;;  %687 = vadd.xlane.f32.xlu0 %v2907_v49 }
 0x10d   : > { %v654_v51 = vpop.f32.mrb[15].mxu0  ;;  %v2917_v54 = vadd.f32 %v2206_v50, %v2060_v22 }
 0x10e   : > { %v2913_v53 = vadd.f32 %v2060_v22, %v654_v51 }
 0x110   : > { %689 = vadd.xlane.f32.xlu1 %v2911_v52  ;;  %691 = vadd.xlane.f32.xlu0 %v2913_v53 }
 0x114   : > { %693 = vadd.xlane.f32.xlu1 %v2917_v54 }
 0x181   : > { %v664_v57 = vpop.xlane.xlu0 %663 }
 0x182   : > { %v695_v58 = vmul.f32 0.015625, %v664_v57 }
 0x184   : > { %v714_v59 = vsub.f32 %v585_v25, %v695_v58 }
 0x185   : > { %v668_v60 = vpop.xlane.xlu1 %667  ;;  %v666_v61 = vpop.xlane.xlu0 %665 }
 0x186   : > { %v697_v62 = vmul.f32 0.015625, %v668_v60  ;;  %v696_v63 = vmul.f32 0.015625, %v666_v61  ;;  %v2925_v0 = vsel %vm713_vm1, %v714_v59, 0.0 }
 0x187   : > { %v748_v1 = vmul.f32 %v2925_v0, %v2925_v0 }
 0x188   : > { %v716_v2 = vsub.f32 %v595_v29, %v697_v62  ;;  %v715_v3 = vsub.f32 %v2878_v28, %v696_v63 }
 0x189   : > { %v670_v4 = vpop.xlane.xlu1 %669  ;;  %764 = vadd.xlane.f32.xlu0 %v748_v1  ;;  %v672_v5 = vpop.xlane.xlu0 %671 }
 0x18a   : > { %v698_v6 = vmul.f32 0.015625, %v670_v4  ;;  %v699_v7 = vmul.f32 0.015625, %v672_v5  ;;  %v2932_v8 = vsel %vm713_vm1, %v716_v2, 0.0  ;;  %v2936_v9 = vsel %vm713_vm1, %v715_v3, 0.0  ;;  %v987_v4 = vld [vmem:[%s3772_s2 + $0x8] sm:$0xff] }
 0x18b   : > { %v750_v10 = vmul.f32 %v2932_v8, %v2932_v8  ;;  %v749_v11 = vmul.f32 %v2936_v9, %v2936_v9 }
 0x18c   : > { %v717_v12 = vsub.f32 %v2881_v32, %v698_v6  ;;  %v718_v13 = vsub.f32 %v2883_v33, %v699_v7 }
 0x18d   : > { %v674_v14 = vpop.xlane.xlu1 %673  ;;  %768 = vadd.xlane.f32.xlu0 %v750_v10  ;;  %766 = vadd.xlane.f32.xlu1 %v749_v11  ;;  %v676_v15 = vpop.xlane.xlu0 %675 }
 0x18e   : > { %v700_v16 = vmul.f32 0.015625, %v674_v14  ;;  %v701_v17 = vmul.f32 0.015625, %v676_v15  ;;  %v2946_v18 = vsel %vm713_vm1, %v717_v12, 0.0  ;;  %v2950_v19 = vsel %vm713_vm1, %v718_v13, 0.0  ;;  %v989_v15 = vld [vmem:[%s3772_s2 + $0x18] sm:$0xff] }
 0x18f   : > { %v751_v20 = vmul.f32 %v2946_v18, %v2946_v18  ;;  %v752_v21 = vmul.f32 %v2950_v19, %v2950_v19 }
 0x190   : > { %v719_v22 = vsub.f32 %v2887_v36, %v700_v16  ;;  %v720_v23 = vsub.f32 %v2889_v37, %v701_v17 }
 0x191   : > { %v678_v24 = vpop.xlane.xlu1 %677  ;;  %770 = vadd.xlane.f32.xlu1 %v751_v20  ;;  %772 = vadd.xlane.f32.xlu0 %v752_v21  ;;  %v680_v25 = vpop.xlane.xlu0 %679 }
 0x192   : > { %v702_v26 = vmul.f32 0.015625, %v678_v24  ;;  %v703_v27 = vmul.f32 0.015625, %v680_v25  ;;  %v2960_v28 = vsel %vm713_vm1, %v719_v22, 0.0  ;;  %v2964_v29 = vsel %vm713_vm1, %v720_v23, 0.0  ;;  %v990_v22 = vld [vmem:[%s3772_s2 + $0x20] sm:$0xff]  ;;  %v992_v24 = vld [vmem:[%s3772_s2 + $0x30] sm:$0xff] }
 0x193   : > { %v753_v30 = vmul.f32 %v2960_v28, %v2960_v28  ;;  %v754_v31 = vmul.f32 %v2964_v29, %v2964_v29  ;;  %v993_v25 = vld [vmem:[%s3772_s2 + $0x38] sm:$0xff] }
 0x194   : > { %v721_v32 = vsub.f32 %v2893_v40, %v702_v26  ;;  %v722_v33 = vsub.f32 %v2895_v41, %v703_v27  ;;  %v2339_v26 = vpack.c.bf16 %v993_v25, %v992_v24  ;;  %v994_v27 = vld [vmem:[%s3772_s2 + $0x40] sm:$0xff] }
 0x195   : > { %v682_v34 = vpop.xlane.xlu1 %681  ;;  %774 = vadd.xlane.f32.xlu1 %v753_v30  ;;  %776 = vadd.xlane.f32.xlu0 %v754_v31  ;;  %v684_v35 = vpop.xlane.xlu0 %683  ;;  %v995_v30 = vld [vmem:[%s3772_s2 + $0x48] sm:$0xff] }
 0x196   : > { %v704_v36 = vmul.f32 0.015625, %v682_v34  ;;  %v705_v37 = vmul.f32 0.015625, %v684_v35  ;;  %v2974_v38 = vsel %vm713_vm1, %v721_v32, 0.0  ;;  %v2978_v39 = vsel %vm713_vm1, %v722_v33, 0.0  ;;  %v996_v32 = vld [vmem:[%s3772_s2 + $0x50] sm:$0xff]  ;;  %v997_v33 = vld [vmem:[%s3772_s2 + $0x58] sm:$0xff] }
 0x197   : > { %v755_v42 = vmul.f32 %v2974_v38, %v2974_v38  ;;  %v756_v40 = vmul.f32 %v2978_v39, %v2978_v39  ;;  %v2343_v31 = vpack.c.bf16 %v995_v30, %v994_v27  ;;  %v2347_v34 = vpack.c.bf16 %v997_v33, %v996_v32  ;;  %v998_v35 = vld [vmem:[%s3772_s2 + $0x60] sm:$0xff] }
 0x198   : > { %v723_v41 = vsub.f32 %v2899_v44, %v704_v36  ;;  %v724_v43 = vsub.f32 %v2901_v45, %v705_v37  ;;  %v999_v36 = vld [vmem:[%s3772_s2 + $0x68] sm:$0xff] }
 0x199   : > { %v686_v46 = vpop.xlane.xlu1 %685  ;;  %778 = vadd.xlane.f32.xlu1 %v755_v42  ;;  %780 = vadd.xlane.f32.xlu0 %v756_v40  ;;  %v688_v47 = vpop.xlane.xlu0 %687  ;;  %v2351_v37 = vpack.c.bf16 %v999_v36, %v998_v35  ;;  %v1000_v42 = vld [vmem:[%s3772_s2 + $0x70] sm:$0xff]  ;;  %v1001_v40 = vld [vmem:[%s3772_s2 + $0x78] sm:$0xff] }
 0x19a   : > { %v706_v50 = vmul.f32 0.015625, %v686_v46  ;;  %v707_v51 = vmul.f32 0.015625, %v688_v47  ;;  %v2988_v55 = vsel %vm713_vm1, %v723_v41, 0.0  ;;  %v2992_v57 = vsel %vm713_vm1, %v724_v43, 0.0 }
 0x19b   : > { %v757_v58 = vmul.f32 %v2988_v55, %v2988_v55  ;;  %v758_v44 = vmul.f32 %v2992_v57, %v2992_v57  ;;  %v2355_v41 = vpack.c.bf16 %v1001_v40, %v1000_v42 }
 0x19c   : > { %v725_v45 = vsub.f32 %v2905_v48, %v706_v50  ;;  %v726_v59 = vsub.f32 %v2907_v49, %v707_v51  ;;  %v986_v49 = vld [vmem:[%s3772_s2] sm:$0xff] }
 0x19d   : > { %v690_v60 = vpop.xlane.xlu1 %689  ;;  %782 = vadd.xlane.f32.xlu1 %v757_v58  ;;  %784 = vadd.xlane.f32.xlu0 %v758_v44  ;;  %v692_v61 = vpop.xlane.xlu0 %691  ;;  %v2327_v7 = vpack.c.bf16 %v987_v4, %v986_v49 }
 0x19e   : > { %v708_v62 = vmul.f32 0.015625, %v690_v60  ;;  %v709_v63 = vmul.f32 0.015625, %v692_v61  ;;  %v3002_v1 = vsel %vm713_vm1, %v725_v45, 0.0  ;;  %v3006_v2 = vsel %vm713_vm1, %v726_v59, 0.0 }
 0x19f   : > { %v759_v3 = vmul.f32 %v3002_v1, %v3002_v1  ;;  %v760_v48 = vmul.f32 %v3006_v2, %v3006_v2  ;;  %2328 = vmatprep.subr.bf16.mxu1 %v2327_v7 }
 0x1a0   : > { %v727_v5 = vsub.f32 %v2911_v52, %v708_v62  ;;  %v728_v6 = vsub.f32 %v2913_v53, %v709_v63  ;;  %2330 = vmatpush3.bf16.msra.mxu1 %v2327_v7  ;;  %v988_v53 = vld [vmem:[%s3772_s2 + $0x10] sm:$0xff] }
 0x1a1   : > { %v694_v10 = vpop.xlane.xlu1 %693  ;;  %786 = vadd.xlane.f32.xlu1 %v759_v3  ;;  %788 = vadd.xlane.f32.xlu0 %v760_v48  ;;  %v2331_v17 = vpack.c.bf16 %v989_v15, %v988_v53 }
 0x1a2   : > { %v710_v11 = vmul.f32 0.015625, %v694_v10  ;;  %v3022_v12 = vsel %vm713_vm1, %v727_v5, 0.0  ;;  %v3026_v13 = vsel %vm713_vm1, %v728_v6, 0.0 }
 0x1a3   : > { %v761_v14 = vmul.f32 %v3022_v12, %v3022_v12  ;;  %v762_v52 = vmul.f32 %v3026_v13, %v3026_v13  ;;  %2332 = vmatprep.subr.bf16.mxu1 %v2331_v17 }
 0x1a4   : > { %v729_v16 = vsub.f32 %v2917_v54, %v710_v11  ;;  %2334 = vmatpush3.bf16.msra.mxu1 %v2331_v17  ;;  %v991_v54 = vld [vmem:[%s3772_s2 + $0x28] sm:$0xff] }
 0x1a5   : > { %790 = vadd.xlane.f32.xlu1 %v761_v14  ;;  %792 = vadd.xlane.f32.xlu0 %v762_v52  ;;  %v2335_v23 = vpack.c.bf16 %v991_v54, %v990_v22  ;;  %v3084_v14 = vld [vmem:[%s3777_s7] ss:$0 sm:$0xff] }
 0x1a6   : > { %v3041_v20 = vsel %vm713_vm1, %v729_v16, 0.0 }
 0x1a7   : > { %v763_v21 = vmul.f32 %v3041_v20, %v3041_v20  ;;  %2336 = vmatprep.subr.bf16.mxu1 %v2335_v23 }
 0x1a8   : > { %2338 = vmatpush3.bf16.msra.mxu1 %v2335_v23 }
 0x1a9   : > { %794 = vadd.xlane.f32.xlu1 %v763_v21  ;;  %2340 = vmatprep.subr.bf16.mxu1 %v2339_v26  ;;  %v3090_v21 = vld [vmem:[%s3780_s10] ss:$0 sm:$0xff] }
 0x1ac   : > { %2342 = vmatpush3.bf16.msra.mxu1 %v2339_v26 }
 0x1ad   : > { %2344 = vmatprep.subr.bf16.mxu1 %v2343_v31 }
 0x1b0   : > { %2346 = vmatpush3.bf16.msra.mxu1 %v2343_v31 }
 0x1b1   : > { %2348 = vmatprep.subr.bf16.mxu1 %v2347_v34 }
 0x1b4   : > { %2350 = vmatpush3.bf16.msra.mxu1 %v2347_v34 }
 0x1b5   : > { %2352 = vmatprep.subr.bf16.mxu1 %v2351_v37 }
 0x1b8   : > { %2354 = vmatpush3.bf16.msra.mxu1 %v2351_v37 }
 0x1b9   : > { %2356 = vmatprep.subr.bf16.mxu1 %v2355_v41 }
 0x1bc   : > { %2358 = vmatpush3.bf16.msra.mxu1 %v2355_v41 }
 0x216   : > { %v765_v43 = vpop.xlane.xlu0 %764 }
 0x217   : > { %v796_v46 = vmul.f32 0.015625, %v765_v43 }
 0x219   : > { %v812_v47 = vadd.f32 1e-05, %v796_v46 }
 0x21a   : > { %v767_v50 = vpop.xlane.xlu1 %766  ;;  %v769_v51 = vpop.xlane.xlu0 %768 }
 0x21b   : > { %2448 = vrsqrt.f32 %v812_v47  ;;  %v797_v58 = vmul.f32 0.015625, %v767_v50  ;;  %v798_v44 = vmul.f32 0.015625, %v769_v51 }
 0x21d   : > { %v813_v45 = vadd.f32 1e-05, %v797_v58  ;;  %v814_v59 = vadd.f32 1e-05, %v798_v44 }
 0x21e   : > { %v771_v60 = vpop.xlane.xlu1 %770  ;;  %v773_v61 = vpop.xlane.xlu0 %772 }
 0x21f   : > { %2450 = vrsqrt.f32 %v813_v45  ;;  %v799_v62 = vmul.f32 0.015625, %v771_v60  ;;  %v800_v63 = vmul.f32 0.015625, %v773_v61 }
 0x220   : > { %2452 = vrsqrt.f32 %v814_v59 }
 0x221   : > { %v815_v3 = vadd.f32 1e-05, %v799_v62  ;;  %v816_v48 = vadd.f32 1e-05, %v800_v63 }
 0x222   : > { %v775_v49 = vpop.xlane.xlu1 %774  ;;  %v777_v4 = vpop.xlane.xlu0 %776 }
 0x223   : > { %2454 = vrsqrt.f32 %v815_v3  ;;  %v801_v5 = vmul.f32 0.015625, %v775_v49  ;;  %v802_v6 = vmul.f32 0.015625, %v777_v4 }
 0x224   : > { %2456 = vrsqrt.f32 %v816_v48 }
 0x225   : > { %v2449_v7 = vpop.eup %2448  ;;  %v817_v10 = vadd.f32 1e-05, %v801_v5  ;;  %v818_v11 = vadd.f32 1e-05, %v802_v6 }
 0x226   : > { %v779_v52 = vpop.xlane.xlu1 %778  ;;  %v781_v53 = vpop.xlane.xlu0 %780  ;;  %v844_v15 = vmul.f32 %v2449_v7, %v2925_v0 }
 0x227   : > { %2458 = vrsqrt.f32 %v817_v10  ;;  %v803_v16 = vmul.f32 0.015625, %v779_v52  ;;  %v804_v17 = vmul.f32 0.015625, %v781_v53 }
 0x228   : > { %v867_v22 = vmul.f32 %v3084_v14, %v844_v15  ;;  %2460 = vrsqrt.f32 %v818_v11 }
 0x229   : > { %v2451_v54 = vpop.eup %2450  ;;  %v819_v23 = vadd.f32 1e-05, %v803_v16  ;;  %v820_v24 = vadd.f32 1e-05, %v804_v17 }
 0x22a   : > { %v2453_v25 = vpop.eup %2452  ;;  %v783_v26 = vpop.xlane.xlu1 %782  ;;  %v890_v30 = vadd.f32 %v3090_v21, %v867_v22  ;;  %v845_v0 = vmul.f32 %v2451_v54, %v2936_v9 }
 0x22b   : > { %v785_v27 = vpop.xlane.xlu0 %784  ;;  %2462 = vrsqrt.f32 %v819_v23  ;;  %v805_v31 = vmul.f32 0.015625, %v783_v26  ;;  %v846_v33 = vmul.f32 %v2453_v25, %v2932_v8 }
 0x22c   : > { %v806_v32 = vmul.f32 0.015625, %v785_v27  ;;  %v922_v34 = vmul.f32 0.70710677, %v890_v30  ;;  %v868_v35 = vmul.f32 %v3084_v14, %v845_v0  ;;  %2464 = vrsqrt.f32 %v820_v24 }
 0x22d   : > { %v2455_v36 = vpop.eup %2454  ;;  %v821_v37 = vadd.f32 1e-05, %v805_v31  ;;  %v869_v40 = vmul.f32 %v3084_v14, %v846_v33  ;;  %v906_v25 = vmul.f32 0.5, %v890_v30 }
 0x22e   : > { %v822_v42 = vadd.f32 1e-05, %v806_v32  ;;  %v2457_v41 = vpop.eup %2456  ;;  %v787_v43 = vpop.xlane.xlu1 %786  ;;  %2466 = verf.f32 %v922_v34  ;;  %v3099_v9 = vadd.f32 %v3090_v21, %v868_v35  ;;  %v847_v47 = vmul.f32 %v2455_v36, %v2946_v18 }
 0x22f   : > { %v789_v46 = vpop.xlane.xlu0 %788  ;;  %2468 = vrsqrt.f32 %v821_v37  ;;  %v807_v8 = vmul.f32 0.015625, %v787_v43  ;;  %v3103_v51 = vadd.f32 %v3090_v21, %v869_v40  ;;  %v848_v61 = vmul.f32 %v2457_v41, %v2950_v19 }
 0x230   : > { %v808_v50 = vmul.f32 0.015625, %v789_v46  ;;  %2470 = vrsqrt.f32 %v822_v42  ;;  %v923_v58 = vmul.f32 0.70710677, %v3099_v9  ;;  %v870_v44 = vmul.f32 %v3084_v14, %v847_v47 }
 0x231   : > { %v2459_v45 = vpop.eup %2458  ;;  %v823_v59 = vadd.f32 1e-05, %v807_v8  ;;  %v924_v18 = vmul.f32 0.70710677, %v3103_v51  ;;  %v871_v6 = vmul.f32 %v3084_v14, %v848_v61 }
 0x232   : > { %v824_v60 = vadd.f32 1e-05, %v808_v50  ;;  %v791_v62 = vpop.xlane.xlu1 %790  ;;  %2472 = verf.f32 %v923_v58  ;;  %v3110_v3 = vadd.f32 %v3090_v21, %v870_v44  ;;  %v849_v48 = vmul.f32 %v2459_v45, %v2960_v28  ;;  %v2461_v49 = vpop.eup %2460 }
 0x233   : > { %v793_v63 = vpop.xlane.xlu0 %792  ;;  %2474 = vrsqrt.f32 %v823_v59  ;;  %v809_v4 = vmul.f32 0.015625, %v791_v62  ;;  %v894_v53 = vadd.f32 %v3090_v21, %v871_v6  ;;  %v850_v16 = vmul.f32 %v2461_v49, %v2964_v29 }
 0x234   : > { %v810_v5 = vmul.f32 0.015625, %v793_v63  ;;  %2476 = vrsqrt.f32 %v824_v60  ;;  %v925_v7 = vmul.f32 0.70710677, %v3110_v3  ;;  %v872_v19 = vmul.f32 %v3084_v14, %v849_v48 }
 0x235   : > { %v2463_v10 = vpop.eup %2462  ;;  %v825_v11 = vadd.f32 1e-05, %v809_v4  ;;  %2478 = verf.f32 %v924_v18  ;;  %v926_v23 = vmul.f32 0.70710677, %v894_v53  ;;  %v873_v27 = vmul.f32 %v3084_v14, %v850_v16 }
 0x236   : > { %v826_v52 = vadd.f32 1e-05, %v810_v5  ;;  %v795_v15 = vpop.xlane.xlu1 %794  ;;  %2480 = verf.f32 %v925_v7  ;;  %v3118_v28 = vadd.f32 %v3090_v21, %v872_v19  ;;  %v851_v17 = vmul.f32 %v2463_v10, %v2974_v38  ;;  %v2465_v22 = vpop.eup %2464 }
 0x237   : > { %2482 = vrsqrt.f32 %v825_v11  ;;  %v811_v54 = vmul.f32 0.015625, %v795_v15  ;;  %v3126_v38 = vadd.f32 %v3090_v21, %v873_v27  ;;  %v852_v34 = vmul.f32 %v2465_v22, %v2978_v39 }
 0x238   : > { %v2467_v24 = vpop.eup %2466  ;;  %2484 = vrsqrt.f32 %v826_v52  ;;  %v927_v26 = vmul.f32 0.70710677, %v3118_v28  ;;  %v874_v33 = vmul.f32 %v3084_v14, %v851_v17  ;;  %v907_v39 = vmul.f32 0.5, %v3099_v9 }
 0x239   : > { %v2469_v0 = vpop.eup %2468  ;;  %v827_v31 = vadd.f32 1e-05, %v811_v54  ;;  %v954_v32 = vadd.f32 1.0, %v2467_v24  ;;  %2486 = verf.f32 %v926_v23  ;;  %v928_v40 = vmul.f32 0.70710677, %v3126_v38 }
 0x23a   : > { %v2471_v29 = vpop.eup %2470  ;;  %2488 = verf.f32 %v927_v26  ;;  %v853_v35 = vmul.f32 %v2469_v0, %v2988_v55  ;;  %v3131_v36 = vadd.f32 %v3090_v21, %v874_v33  ;;  %v875_v41 = vmul.f32 %v3084_v14, %v852_v34 }
 0x23b   : > { %2490 = vrsqrt.f32 %v827_v31  ;;  %v970_v30 = vmul.f32 %v954_v32, %v906_v25  ;;  %v854_v37 = vmul.f32 %v2471_v29, %v2992_v57  ;;  %v908_v62 = vmul.f32 0.5, %v3103_v51 }
 0x23c   : > { %v2473_v42 = vpop.eup %2472  ;;  %v876_v43 = vmul.f32 %v3084_v14, %v853_v35  ;;  %v929_v55 = vmul.f32 0.70710677, %v3131_v36  ;;  %2492 = verf.f32 %v928_v40  ;;  %v3141_v57 = vadd.f32 %v3090_v21, %v875_v41 }
 0x23d   : > { %v2475_v46 = vpop.eup %2474  ;;  %2239 = vmatprep.mubr.f32.mxu1 %v970_v30  ;;  %v955_v47 = vadd.f32 1.0, %v2473_v42  ;;  %v877_v8 = vmul.f32 %v3084_v14, %v854_v37  ;;  %v909_v18 = vmul.f32 0.5, %v3110_v3  ;;  %v911_v54 = vmul.f32 0.5, %v3118_v28 }
 0x23e   : > { %v2477_v50 = vpop.eup %2476  ;;  %v3144_v58 = vadd.f32 %v3090_v21, %v876_v43  ;;  %v855_v44 = vmul.f32 %v2475_v46, %v3002_v1  ;;  %2494 = verf.f32 %v929_v55  ;;  %v930_v48 = vmul.f32 0.70710677, %v3141_v57 }
 0x23f   : > { %v2479_v45 = vpop.eup %2478  ;;  %v971_v59 = vmul.f32 %v955_v47, %v907_v39  ;;  %v3148_v9 = vadd.f32 %v3090_v21, %v877_v8  ;;  %v856_v60 = vmul.f32 %v2477_v50, %v3006_v2  ;;  %v910_v1 = vmul.f32 0.5, %v894_v53 }
 0x240   : > { %v2481_v61 = vpop.eup %2480  ;;  %v956_v63 = vadd.f32 1.0, %v2479_v45  ;;  %v931_v5 = vmul.f32 0.70710677, %v3144_v58  ;;  %2496 = verf.f32 %v930_v48  ;;  %v878_v2 = vmul.f32 %v3084_v14, %v855_v44 }
 0x241   : > { %v2483_v49 = vpop.eup %2482  ;;  %2240 = vmatmul.mubr.f32.vlgmr.msra.gmra.mrb[0].mxu1 %v971_v59  ;;  %v957_v4 = vadd.f32 1.0, %v2481_v61  ;;  %v932_v6 = vmul.f32 0.70710677, %v3148_v9  ;;  %v879_v51 = vmul.f32 %v3084_v14, %v856_v60  ;;  %v912_v28 = vmul.f32 0.5, %v3126_v38 }
 0x242   : > { %v2485_v7 = vpop.eup %2484  ;;  %v972_v19 = vmul.f32 %v956_v63, %v908_v62  ;;  %2498 = verf.f32 %v931_v5  ;;  %v857_v3 = vmul.f32 %v2483_v49, %v3022_v12  ;;  %v901_v16 = vadd.f32 %v3090_v21, %v878_v2 }
 0x243   : > { %v2487_v10 = vpop.eup %2486  ;;  %v973_v11 = vmul.f32 %v957_v4, %v909_v18  ;;  %v858_v52 = vmul.f32 %v2485_v7, %v3026_v13  ;;  %2500 = verf.f32 %v932_v6  ;;  %v902_v17 = vadd.f32 %v3090_v21, %v879_v51 }
 0x244   : > { %v2489_v15 = vpop.eup %2488  ;;  %2242 = vmatprep.mubr.f32.mxu1 %v972_v19  ;;  %v958_v53 = vadd.f32 1.0, %v2487_v10  ;;  %v880_v24 = vmul.f32 %v3084_v14, %v857_v3  ;;  %v933_v26 = vmul.f32 0.70710677, %v901_v16  ;;  %v913_v30 = vmul.f32 0.5, %v3131_v36  ;;  %v2079_v3 = vld [vmem:[%s3775_s5] ss:$0 sm:$0xff] }
 0x245   : > { %v2491_v22 = vpop.eup %2490  ;;  %2243 = vmatmul.mubr.f32.gmra.mrb[2].mxu1 %v973_v11  ;;  %v959_v23 = vadd.f32 1.0, %v2489_v15  ;;  %v881_v25 = vmul.f32 %v3084_v14, %v858_v52  ;;  %v934_v27 = vmul.f32 0.70710677, %v902_v17  ;;  %v914_v38 = vmul.f32 0.5, %v3141_v57 }
 0x246   : > { %v974_v12 = vmul.f32 %v958_v53, %v910_v1  ;;  %v903_v0 = vadd.f32 %v3090_v21, %v880_v24  ;;  %v2493_v32 = vpop.eup %2492  ;;  %2502 = verf.f32 %v933_v26  ;;  %v859_v33 = vmul.f32 %v2491_v22, %v3041_v20 }
 0x247   : > { %v975_v13 = vmul.f32 %v959_v23, %v911_v54  ;;  %v904_v31 = vadd.f32 %v3090_v21, %v881_v25  ;;  %v960_v34 = vadd.f32 1.0, %v2493_v32  ;;  %2504 = verf.f32 %v934_v27 }
 0x248   : > { %2245 = vmatprep.mubr.f32.mxu1 %v974_v12  ;;  %v2495_v29 = vpop.eup %2494  ;;  %v935_v35 = vmul.f32 0.70710677, %v903_v0  ;;  %v882_v40 = vmul.f32 %v3084_v14, %v859_v33  ;;  %v915_v36 = vmul.f32 0.5, %v3144_v58  ;;  %v916_v14 = vmul.f32 0.5, %v3148_v9 }
 0x249   : > { %2246 = vmatmul.mubr.f32.gmra.mrb[4].mxu1 %v975_v13  ;;  %v961_v37 = vadd.f32 1.0, %v2495_v29  ;;  %v936_v42 = vmul.f32 0.70710677, %v904_v31  ;;  %v976_v41 = vmul.f32 %v960_v34, %v912_v28  ;;  %v917_v57 = vmul.f32 0.5, %v901_v16 }
 0x24a   : > { %2506 = verf.f32 %v935_v35  ;;  %v2497_v43 = vpop.eup %2496  ;;  %v905_v20 = vadd.f32 %v3090_v21, %v882_v40  ;;  %v918_v63 = vmul.f32 0.5, %v902_v17  ;;  %v919_v1 = vmul.f32 0.5, %v903_v0 }
 0x24b   : > { %v977_v46 = vmul.f32 %v961_v37, %v913_v30  ;;  %2508 = verf.f32 %v936_v42  ;;  %2248 = vmatprep.mubr.f32.mxu1 %v976_v41  ;;  %v962_v47 = vadd.f32 1.0, %v2497_v43  ;;  %v920_v9 = vmul.f32 0.5, %v904_v31 }
 0x24c   : > { %v2499_v39 = vpop.eup %2498  ;;  %v937_v50 = vmul.f32 0.70710677, %v905_v20  ;;  %v921_v51 = vmul.f32 0.5, %v905_v20 }
 0x24d   : > { %v2501_v55 = vpop.eup %2500  ;;  %2249 = vmatmul.mubr.f32.gmra.mrb[6].mxu1 %v977_v46  ;;  %v963_v8 = vadd.f32 1.0, %v2499_v39  ;;  %v978_v44 = vmul.f32 %v962_v47, %v914_v38 }
 0x24e   : > { %v964_v45 = vadd.f32 1.0, %v2501_v55  ;;  %2510 = verf.f32 %v937_v50 }
 0x24f   : > { %v979_v59 = vmul.f32 %v963_v8, %v915_v36  ;;  %2251 = vmatprep.mubr.f32.mxu1 %v978_v44 }
 0x250   : > { %v980_v60 = vmul.f32 %v964_v45, %v916_v14  ;;  %v2503_v21 = vpop.eup %2502 }
 0x251   : > { %2252 = vmatmul.mubr.f32.gmra.mrb[8].mxu1 %v979_v59  ;;  %v2505_v61 = vpop.eup %2504  ;;  %v965_v62 = vadd.f32 1.0, %v2503_v21 }
 0x252   : > { %2254 = vmatprep.mubr.f32.mxu1 %v980_v60  ;;  %v966_v18 = vadd.f32 1.0, %v2505_v61 }
 0x253   : > { %v981_v58 = vmul.f32 %v965_v62, %v917_v57 }
 0x254   : > { %v2507_v48 = vpop.eup %2506  ;;  %v982_v4 = vmul.f32 %v966_v18, %v918_v63 }
 0x255   : > { %v2509_v49 = vpop.eup %2508  ;;  %v967_v5 = vadd.f32 1.0, %v2507_v48  ;;  %2255 = vmatmul.mubr.f32.gmra.mrb[10].mxu1 %v981_v58 }
 0x256   : > { %v968_v6 = vadd.f32 1.0, %v2509_v49  ;;  %2257 = vmatprep.mubr.f32.mxu1 %v982_v4 }
 0x257   : > { %v983_v7 = vmul.f32 %v967_v5, %v919_v1 }
 0x258   : > { %v984_v19 = vmul.f32 %v968_v6, %v920_v9  ;;  %v2511_v2 = vpop.eup %2510 }
 0x259   : > { %2258 = vmatmul.mubr.f32.gmra.mrb[12].mxu1 %v983_v7  ;;  %v969_v10 = vadd.f32 1.0, %v2511_v2 }
 0x25a   : > { %2260 = vmatprep.mubr.f32.mxu1 %v984_v19 }
 0x25b   : > { %v985_v11 = vmul.f32 %v969_v10, %v921_v51 }
 0x25d   : > { %2261 = vmatmul.mubr.f32.gmra.mrb[14].mxu1 %v985_v11 }
 0x314   : > { %v2241_v52 = vpop.f32.mrb[0].mxu1 }
 0x315   : > { %v1081_v15 = vadd.f32 %v2241_v52, %v2079_v3  ;;  %v1075_v53 = vpop.f32.mrb[1].mxu1 }
 0x316   : > { %v1076_v16 = vadd.f32 %v2079_v3, %v1075_v53 }
 0x317   : > { %1156 = vadd.xlane.f32.xlu1 %v1081_v15 }
 0x318   : > { %1154 = vadd.xlane.f32.xlu0 %v1076_v16  ;;  %v2244_v17 = vpop.f32.mrb[2].mxu1 }
 0x319   : > { %v3178_v22 = vadd.f32 %v2244_v17, %v2079_v3  ;;  %v1085_v54 = vpop.f32.mrb[3].mxu1 }
 0x31a   : > { %v3180_v23 = vadd.f32 %v2079_v3, %v1085_v54 }
 0x31b   : > { %1160 = vadd.xlane.f32.xlu1 %v3178_v22 }
 0x31c   : > { %1158 = vadd.xlane.f32.xlu0 %v3180_v23  ;;  %v2247_v24 = vpop.f32.mrb[4].mxu1 }
 0x31d   : > { %v3184_v25 = vadd.f32 %v2247_v24, %v2079_v3  ;;  %v1095_v12 = vpop.f32.mrb[5].mxu1 }
 0x31e   : > { %v3186_v26 = vadd.f32 %v2079_v3, %v1095_v12 }
 0x31f   : > { %1164 = vadd.xlane.f32.xlu1 %v3184_v25 }
 0x320   : > { %1162 = vadd.xlane.f32.xlu0 %v3186_v26  ;;  %v2250_v13 = vpop.f32.mrb[6].mxu1 }
 0x321   : > { %v3190_v27 = vadd.f32 %v2250_v13, %v2079_v3  ;;  %v1105_v0 = vpop.f32.mrb[7].mxu1 }
 0x322   : > { %v3192_v31 = vadd.f32 %v2079_v3, %v1105_v0 }
 0x323   : > { %1168 = vadd.xlane.f32.xlu1 %v3190_v27 }
 0x324   : > { %1166 = vadd.xlane.f32.xlu0 %v3192_v31  ;;  %v2253_v32 = vpop.f32.mrb[8].mxu1 }
 0x325   : > { %v3196_v33 = vadd.f32 %v2253_v32, %v2079_v3  ;;  %v1115_v29 = vpop.f32.mrb[9].mxu1 }
 0x326   : > { %v3198_v28 = vadd.f32 %v2079_v3, %v1115_v29 }
 0x327   : > { %1172 = vadd.xlane.f32.xlu1 %v3196_v33 }
 0x328   : > { %1170 = vadd.xlane.f32.xlu0 %v3198_v28  ;;  %v2256_v34 = vpop.f32.mrb[10].mxu1 }
 0x329   : > { %v3202_v35 = vadd.f32 %v2256_v34, %v2079_v3  ;;  %v1125_v30 = vpop.f32.mrb[11].mxu1 }
 0x32a   : > { %v3204_v37 = vadd.f32 %v2079_v3, %v1125_v30 }
 0x32b   : > { %1176 = vadd.xlane.f32.xlu1 %v3202_v35 }
 0x32c   : > { %1174 = vadd.xlane.f32.xlu0 %v3204_v37  ;;  %v2259_v42 = vpop.f32.mrb[12].mxu1 }
 0x32d   : > { %v1135_v40 = vpop.f32.mrb[13].mxu1  ;;  %v3211_v20 = vadd.f32 %v2259_v42, %v2079_v3 }
 0x32e   : > { %v3208_v41 = vadd.f32 %v2079_v3, %v1135_v40 }
 0x330   : > { %1178 = vadd.xlane.f32.xlu0 %v3208_v41  ;;  %v2262_v43 = vpop.f32.mrb[14].mxu1 }
 0x331   : > { %v1145_v46 = vpop.f32.mrb[15].mxu1  ;;  %v3217_v38 = vadd.f32 %v2262_v43, %v2079_v3 }
 0x332   : > { %v3213_v39 = vadd.f32 %v2079_v3, %v1145_v46 }
 0x334   : > { %1180 = vadd.xlane.f32.xlu0 %v3211_v20  ;;  %1182 = vadd.xlane.f32.xlu1 %v3213_v39 }
 0x338   : > { %1184 = vadd.xlane.f32.xlu1 %v3217_v38 }
 0x3a4   : > { %v1157_v47 = vpop.xlane.xlu1 %1156 }
 0x3a5   : > { %v1187_v55 = vmul.f32 0.015625, %v1157_v47  ;;  %v1155_v36 = vpop.xlane.xlu0 %1154 }
 0x3a6   : > { %v1186_v8 = vmul.f32 0.015625, %v1155_v36 }
 0x3a7   : > { %v1203_v50 = vsub.f32 %v1081_v15, %v1187_v55 }
 0x3a8   : > { %v1202_v44 = vsub.f32 %v1076_v16, %v1186_v8  ;;  %v1161_v14 = vpop.xlane.xlu1 %1160 }
 0x3a9   : > { %v1189_v45 = vmul.f32 0.015625, %v1161_v14  ;;  %v1159_v59 = vpop.xlane.xlu0 %1158  ;;  %v3222_v60 = vsel %vm713_vm1, %v1203_v50, 0.0  ;;  %v1472_v14 = vld [vmem:[%s3773_s3] sm:$0xff] }
 0x3aa   : > { %v1188_v21 = vmul.f32 0.015625, %v1159_v59  ;;  %v1235_v61 = vmul.f32 %v3222_v60, %v3222_v60  ;;  %v3228_v57 = vsel %vm713_vm1, %v1202_v44, 0.0 }
 0x3ab   : > { %v1205_v62 = vsub.f32 %v3178_v22, %v1189_v45  ;;  %v1234_v63 = vmul.f32 %v3228_v57, %v3228_v57  ;;  %v1473_v45 = vld [vmem:[%s3773_s3 + $0x8] sm:$0xff] }
 0x3ac   : > { %v1204_v18 = vsub.f32 %v3180_v23, %v1188_v21  ;;  %v1165_v48 = vpop.xlane.xlu1 %1164  ;;  %1252 = vadd.xlane.f32.xlu1 %v1235_v61 }
 0x3ad   : > { %v1191_v58 = vmul.f32 0.015625, %v1165_v48  ;;  %1250 = vadd.xlane.f32.xlu0 %v1234_v63  ;;  %v1163_v49 = vpop.xlane.xlu0 %1162  ;;  %v3236_v4 = vsel %vm713_vm1, %v1205_v62, 0.0  ;;  %v2359_v62 = vpack.c.bf16 %v1473_v45, %v1472_v14 }
 0x3ae   : > { %v1190_v1 = vmul.f32 0.015625, %v1163_v49  ;;  %v1237_v5 = vmul.f32 %v3236_v4, %v3236_v4  ;;  %v3242_v9 = vsel %vm713_vm1, %v1204_v18, 0.0  ;;  %v1475_v49 = vld [vmem:[%s3773_s3 + $0x18] sm:$0xff] }
 0x3af   : > { %v1207_v6 = vsub.f32 %v3184_v25, %v1191_v58  ;;  %v1236_v7 = vmul.f32 %v3242_v9, %v3242_v9  ;;  %2360 = vmatprep.subr.bf16.mxu0 %v2359_v62  ;;  %2391 = vmatprep.subr.bf16.mxu1 %v2359_v62  ;;  %v1474_v58 = vld [vmem:[%s3773_s3 + $0x10] sm:$0xff] }
 0x3b0   : > { %v1206_v19 = vsub.f32 %v3186_v26, %v1190_v1  ;;  %1256 = vadd.xlane.f32.xlu1 %v1237_v5  ;;  %v1169_v2 = vpop.xlane.xlu1 %1168  ;;  %2362 = vmatpush3.bf16.msra.mxu0 %v2359_v62 }
 0x3b1   : > { %1254 = vadd.xlane.f32.xlu0 %v1236_v7  ;;  %v3250_v51 = vsel %vm713_vm1, %v1207_v6, 0.0  ;;  %v1193_v10 = vmul.f32 0.015625, %v1169_v2  ;;  %v1167_v11 = vpop.xlane.xlu0 %1166  ;;  %2399 = vmatpush3.bf16.msra.mxu1 %v2359_v62  ;;  %v1476_v2 = vld [vmem:[%s3773_s3 + $0x20] sm:$0xff] }
 0x3b2   : > { %v1239_v3 = vmul.f32 %v3250_v51, %v3250_v51  ;;  %v3256_v52 = vsel %vm713_vm1, %v1206_v19, 0.0  ;;  %v1192_v15 = vmul.f32 0.015625, %v1167_v11 }
 0x3b3   : > { %v1238_v53 = vmul.f32 %v3256_v52, %v3256_v52  ;;  %v1209_v16 = vsub.f32 %v3190_v27, %v1193_v10  ;;  %v1477_v10 = vld [vmem:[%s3773_s3 + $0x28] sm:$0xff] }
 0x3b4   : > { %1260 = vadd.xlane.f32.xlu1 %v1239_v3  ;;  %v1208_v17 = vsub.f32 %v3192_v31, %v1192_v15  ;;  %v1173_v22 = vpop.xlane.xlu1 %1172  ;;  %v2367_v3 = vpack.c.bf16 %v1477_v10, %v1476_v2  ;;  %v1478_v15 = vld [vmem:[%s3773_s3 + $0x30] sm:$0xff] }
 0x3b5   : > { %1258 = vadd.xlane.f32.xlu0 %v1238_v53  ;;  %v1195_v54 = vmul.f32 0.015625, %v1173_v22  ;;  %v1171_v23 = vpop.xlane.xlu0 %1170  ;;  %v3264_v24 = vsel %vm713_vm1, %v1209_v16, 0.0  ;;  %v1479_v53 = vld [vmem:[%s3773_s3 + $0x38] sm:$0xff]  ;;  %v1481_v22 = vld [vmem:[%s3773_s3 + $0x48] sm:$0xff] }
 0x3b6   : > { %v1194_v25 = vmul.f32 0.015625, %v1171_v23  ;;  %v1241_v12 = vmul.f32 %v3264_v24, %v3264_v24  ;;  %v3270_v26 = vsel %vm713_vm1, %v1208_v17, 0.0  ;;  %v2371_v16 = vpack.c.bf16 %v1479_v53, %v1478_v15  ;;  %v1480_v17 = vld [vmem:[%s3773_s3 + $0x40] sm:$0xff]  ;;  %v1482_v23 = vld [vmem:[%s3773_s3 + $0x50] sm:$0xff] }
 0x3b7   : > { %v1211_v13 = vsub.f32 %v3196_v33, %v1195_v54  ;;  %v1240_v27 = vmul.f32 %v3270_v26, %v3270_v26  ;;  %v2375_v54 = vpack.c.bf16 %v1481_v22, %v1480_v17 }
 0x3b8   : > { %v1210_v0 = vsub.f32 %v3198_v28, %v1194_v25  ;;  %1264 = vadd.xlane.f32.xlu1 %v1241_v12  ;;  %v1177_v31 = vpop.xlane.xlu1 %1176  ;;  %v1483_v25 = vld [vmem:[%s3773_s3 + $0x58] sm:$0xff] }
 0x3b9   : > { %1262 = vadd.xlane.f32.xlu0 %v1240_v27  ;;  %v3278_v32 = vsel %vm713_vm1, %v1211_v13, 0.0  ;;  %v1197_v29 = vmul.f32 0.015625, %v1177_v31  ;;  %v1175_v34 = vpop.xlane.xlu0 %1174  ;;  %v2379_v12 = vpack.c.bf16 %v1483_v25, %v1482_v23  ;;  %v1484_v13 = vld [vmem:[%s3773_s3 + $0x60] sm:$0xff]  ;;  %v1485_v27 = vld [vmem:[%s3773_s3 + $0x68] sm:$0xff]  ;;  %v1486_v31 = vld [vmem:[%s3773_s3 + $0x70] sm:$0xff] }
 0x3ba   : > { %v1243_v30 = vmul.f32 %v3278_v32, %v3278_v32  ;;  %v3284_v33 = vsel %vm713_vm1, %v1210_v0, 0.0  ;;  %v1196_v42 = vmul.f32 0.015625, %v1175_v34  ;;  %v2383_v0 = vpack.c.bf16 %v1485_v27, %v1484_v13 }
 0x3bb   : > { %v1242_v28 = vmul.f32 %v3284_v33, %v3284_v33  ;;  %v1213_v40 = vsub.f32 %v3202_v35, %v1197_v29  ;;  %v1487_v29 = vld [vmem:[%s3773_s3 + $0x78] sm:$0xff] }
 0x3bc   : > { %1268 = vadd.xlane.f32.xlu1 %v1243_v30  ;;  %v1212_v43 = vsub.f32 %v3204_v37, %v1196_v42  ;;  %v2387_v34 = vpack.c.bf16 %v1487_v29, %v1486_v31 }
 0x3bd   : > { %1266 = vadd.xlane.f32.xlu0 %v1242_v28  ;;  %v1179_v46 = vpop.xlane.xlu0 %1178  ;;  %v3292_v47 = vsel %vm713_vm1, %v1213_v40, 0.0 }
 0x3be   : > { %v1198_v55 = vmul.f32 0.015625, %v1179_v46  ;;  %v1245_v36 = vmul.f32 %v3292_v47, %v3292_v47  ;;  %v3298_v8 = vsel %vm713_vm1, %v1212_v43, 0.0 }
 0x3bf   : > { %v1244_v35 = vmul.f32 %v3298_v8, %v3298_v8 }
 0x3c0   : > { %v1214_v50 = vsub.f32 %v3208_v41, %v1198_v55  ;;  %1272 = vadd.xlane.f32.xlu1 %v1245_v36 }
 0x3c1   : > { %v1183_v37 = vpop.xlane.xlu1 %1182  ;;  %1270 = vadd.xlane.f32.xlu0 %v1244_v35  ;;  %v1181_v44 = vpop.xlane.xlu0 %1180 }
 0x3c2   : > { %v1200_v59 = vmul.f32 0.015625, %v1183_v37  ;;  %v1199_v21 = vmul.f32 0.015625, %v1181_v44  ;;  %v3311_v61 = vsel %vm713_vm1, %v1214_v50, 0.0 }
 0x3c3   : > { %v1246_v41 = vmul.f32 %v3311_v61, %v3311_v61 }
 0x3c4   : > { %v1216_v63 = vsub.f32 %v3213_v39, %v1200_v59  ;;  %v1215_v18 = vsub.f32 %v3211_v20, %v1199_v21  ;;  %v2363_v39 = vpack.c.bf16 %v1475_v49, %v1474_v58  ;;  %v3381_v49 = vld [vmem:[%s3778_s8] ss:$0 sm:$0xff] }
 0x3c5   : > { %v1185_v48 = vpop.xlane.xlu1 %1184  ;;  %1274 = vadd.xlane.f32.xlu0 %v1246_v41 }
 0x3c6   : > { %v1201_v1 = vmul.f32 0.015625, %v1185_v48  ;;  %v3325_v5 = vsel %vm713_vm1, %v1216_v63, 0.0  ;;  %v3329_v20 = vsel %vm713_vm1, %v1215_v18, 0.0  ;;  %2364 = vmatprep.subr.bf16.mxu0 %v2363_v39  ;;  %2392 = vmatprep.subr.bf16.mxu1 %v2363_v39 }
 0x3c7   : > { %v1248_v6 = vmul.f32 %v3325_v5, %v3325_v5  ;;  %v1247_v7 = vmul.f32 %v3329_v20, %v3329_v20  ;;  %2366 = vmatpush3.bf16.msra.mxu0 %v2363_v39  ;;  %2400 = vmatpush3.bf16.msra.mxu1 %v2363_v39 }
 0x3c8   : > { %v1217_v19 = vsub.f32 %v3217_v38, %v1201_v1  ;;  %2368 = vmatprep.subr.bf16.mxu0 %v2367_v3  ;;  %2393 = vmatprep.subr.bf16.mxu1 %v2367_v3 }
 0x3c9   : > { %1278 = vadd.xlane.f32.xlu1 %v1248_v6  ;;  %1276 = vadd.xlane.f32.xlu0 %v1247_v7 }
 0x3ca   : > { %v3344_v11 = vsel %vm713_vm1, %v1217_v19, 0.0 }
 0x3cb   : > { %v1249_v38 = vmul.f32 %v3344_v11, %v3344_v11  ;;  %2370 = vmatpush3.bf16.msra.mxu0 %v2367_v3  ;;  %2401 = vmatpush3.bf16.msra.mxu1 %v2367_v3  ;;  %v3388_v3 = vld [vmem:[%s3781_s11] ss:$0 sm:$0xff] }
 0x3cc   : > { %2372 = vmatprep.subr.bf16.mxu0 %v2371_v16  ;;  %2394 = vmatprep.subr.bf16.mxu1 %v2371_v16 }
 0x3cd   : > { %1280 = vadd.xlane.f32.xlu1 %v1249_v38 }
 0x3cf   : > { %2374 = vmatpush3.bf16.msra.mxu0 %v2371_v16  ;;  %2402 = vmatpush3.bf16.msra.mxu1 %v2371_v16 }
 0x3d0   : > { %2376 = vmatprep.subr.bf16.mxu0 %v2375_v54  ;;  %2395 = vmatprep.subr.bf16.mxu1 %v2375_v54 }
 0x3d3   : > { %2378 = vmatpush3.bf16.msra.mxu0 %v2375_v54  ;;  %2403 = vmatpush3.bf16.msra.mxu1 %v2375_v54 }
 0x3d4   : > { %2380 = vmatprep.subr.bf16.mxu0 %v2379_v12  ;;  %2396 = vmatprep.subr.bf16.mxu1 %v2379_v12 }
 0x3d7   : > { %2382 = vmatpush3.bf16.msra.mxu0 %v2379_v12  ;;  %2404 = vmatpush3.bf16.msra.mxu1 %v2379_v12 }
 0x3d8   : > { %2384 = vmatprep.subr.bf16.mxu0 %v2383_v0  ;;  %2397 = vmatprep.subr.bf16.mxu1 %v2383_v0 }
 0x3db   : > { %2386 = vmatpush3.bf16.msra.mxu0 %v2383_v0  ;;  %2405 = vmatpush3.bf16.msra.mxu1 %v2383_v0 }
 0x3dc   : > { %2388 = vmatprep.subr.bf16.mxu0 %v2387_v34  ;;  %2398 = vmatprep.subr.bf16.mxu1 %v2387_v34 }
 0x3df   : > { %2390 = vmatpush3.bf16.msra.mxu0 %v2387_v34  ;;  %2406 = vmatpush3.bf16.msra.mxu1 %v2387_v34 }
 0x439   : > { %v1253_v30 = vpop.xlane.xlu1 %1252 }
 0x43a   : > { %v1283_v42 = vmul.f32 0.015625, %v1253_v30  ;;  %v1251_v28 = vpop.xlane.xlu0 %1250 }
 0x43b   : > { %v1282_v40 = vmul.f32 0.015625, %v1251_v28 }
 0x43c   : > { %v1299_v43 = vadd.f32 1e-05, %v1283_v42 }
 0x43d   : > { %v1298_v46 = vadd.f32 1e-05, %v1282_v40  ;;  %v1257_v55 = vpop.xlane.xlu1 %1256 }
 0x43e   : > { %2512 = vrsqrt.f32 %v1299_v43  ;;  %v1285_v36 = vmul.f32 0.015625, %v1257_v55  ;;  %v1255_v35 = vpop.xlane.xlu0 %1254 }
 0x43f   : > { %2514 = vrsqrt.f32 %v1298_v46  ;;  %v1284_v50 = vmul.f32 0.015625, %v1255_v35 }
 0x440   : > { %v1301_v37 = vadd.f32 1e-05, %v1285_v36 }
 0x441   : > { %v1300_v44 = vadd.f32 1e-05, %v1284_v50  ;;  %v1261_v14 = vpop.xlane.xlu1 %1260 }
 0x442   : > { %2516 = vrsqrt.f32 %v1301_v37  ;;  %v1287_v45 = vmul.f32 0.015625, %v1261_v14  ;;  %v1259_v59 = vpop.xlane.xlu0 %1258 }
 0x443   : > { %2518 = vrsqrt.f32 %v1300_v44  ;;  %v1286_v21 = vmul.f32 0.015625, %v1259_v59 }
 0x444   : > { %v1303_v62 = vadd.f32 1e-05, %v1287_v45 }
 0x445   : > { %v1302_v41 = vadd.f32 1e-05, %v1286_v21  ;;  %v1265_v63 = vpop.xlane.xlu1 %1264 }
 0x446   : > { %2520 = vrsqrt.f32 %v1303_v62  ;;  %v1289_v18 = vmul.f32 0.015625, %v1265_v63  ;;  %v1263_v48 = vpop.xlane.xlu0 %1262 }
 0x447   : > { %2522 = vrsqrt.f32 %v1302_v41  ;;  %v1288_v1 = vmul.f32 0.015625, %v1263_v48 }
 0x448   : > { %v2513_v58 = vpop.eup %2512  ;;  %v1305_v7 = vadd.f32 1e-05, %v1289_v18 }
 0x449   : > { %v2515_v39 = vpop.eup %2514  ;;  %v1331_v6 = vmul.f32 %v2513_v58, %v3222_v60  ;;  %v1304_v19 = vadd.f32 1e-05, %v1288_v1  ;;  %v1269_v2 = vpop.xlane.xlu1 %1268 }
 0x44a   : > { %v1330_v10 = vmul.f32 %v2515_v39, %v3228_v57  ;;  %2524 = vrsqrt.f32 %v1305_v7  ;;  %v1291_v15 = vmul.f32 0.015625, %v1269_v2  ;;  %v1267_v53 = vpop.xlane.xlu0 %1266 }
 0x44b   : > { %v1354_v38 = vmul.f32 %v3381_v49, %v1331_v6  ;;  %2526 = vrsqrt.f32 %v1304_v19  ;;  %v1290_v17 = vmul.f32 0.015625, %v1267_v53 }
 0x44c   : > { %v2517_v16 = vpop.eup %2516  ;;  %v1353_v60 = vmul.f32 %v3381_v49, %v1330_v10  ;;  %v1307_v54 = vadd.f32 1e-05, %v1291_v15 }
 0x44d   : > { %v2519_v22 = vpop.eup %2518  ;;  %v1377_v23 = vadd.f32 %v3388_v3, %v1354_v38  ;;  %v1333_v57 = vmul.f32 %v2517_v16, %v3236_v4  ;;  %v1306_v25 = vadd.f32 1e-05, %v1290_v17  ;;  %v1273_v27 = vpop.xlane.xlu1 %1272 }
 0x44e   : > { %v3395_v12 = vadd.f32 %v3388_v3, %v1353_v60  ;;  %v1332_v13 = vmul.f32 %v2519_v22, %v3242_v9  ;;  %2528 = vrsqrt.f32 %v1307_v54  ;;  %v1293_v34 = vmul.f32 0.015625, %v1273_v27  ;;  %v1271_v30 = vpop.xlane.xlu0 %1270 }
 0x44f   : > { %v1409_v0 = vmul.f32 0.70710677, %v1377_v23  ;;  %v1356_v31 = vmul.f32 %v3381_v49, %v1333_v57  ;;  %2530 = vrsqrt.f32 %v1306_v25  ;;  %v1292_v40 = vmul.f32 0.015625, %v1271_v30 }
 0x450   : > { %v2521_v29 = vpop.eup %2520  ;;  %v1408_v42 = vmul.f32 0.70710677, %v3395_v12  ;;  %v1355_v4 = vmul.f32 %v3381_v49, %v1332_v13  ;;  %v1309_v9 = vadd.f32 1e-05, %v1293_v34  ;;  %v1393_v38 = vmul.f32 0.5, %v1377_v23 }
 0x451   : > { %v2523_v28 = vpop.eup %2522  ;;  %2532 = verf.f32 %v1409_v0  ;;  %v3402_v43 = vadd.f32 %v3388_v3, %v1356_v31  ;;  %v1335_v55 = vmul.f32 %v2521_v29, %v3250_v51  ;;  %v1308_v36 = vadd.f32 1e-05, %v1292_v40 }
 0x452   : > { %2534 = verf.f32 %v1408_v42  ;;  %v1334_v46 = vmul.f32 %v2523_v28, %v3256_v52  ;;  %v3407_v35 = vadd.f32 %v3388_v3, %v1355_v4  ;;  %v1275_v37 = vpop.xlane.xlu0 %1274 }
 0x453   : > { %v1411_v50 = vmul.f32 0.70710677, %v3402_v43  ;;  %2536 = vrsqrt.f32 %v1309_v9  ;;  %v1358_v14 = vmul.f32 %v3381_v49, %v1335_v55  ;;  %v1294_v59 = vmul.f32 0.015625, %v1275_v37 }
 0x454   : > { %v1357_v44 = vmul.f32 %v3381_v49, %v1334_v46  ;;  %v2525_v45 = vpop.eup %2524  ;;  %2538 = vrsqrt.f32 %v1308_v36  ;;  %v1410_v21 = vmul.f32 0.70710677, %v3407_v35 }
 0x455   : > { %v2527_v52 = vpop.eup %2526  ;;  %2540 = verf.f32 %v1411_v50  ;;  %v3415_v62 = vadd.f32 %v3388_v3, %v1358_v14  ;;  %v1337_v41 = vmul.f32 %v2525_v45, %v3264_v24  ;;  %v1310_v63 = vadd.f32 1e-05, %v1294_v59 }
 0x456   : > { %v1380_v51 = vadd.f32 %v3388_v3, %v1357_v44  ;;  %2542 = verf.f32 %v1410_v21  ;;  %v1336_v18 = vmul.f32 %v2527_v52, %v3270_v26  ;;  %v1279_v48 = vpop.xlane.xlu1 %1278  ;;  %v1277_v58 = vpop.xlane.xlu0 %1276  ;;  %v1394_v50 = vmul.f32 0.5, %v3407_v35 }
 0x457   : > { %v1413_v39 = vmul.f32 0.70710677, %v3415_v62  ;;  %2544 = vrsqrt.f32 %v1310_v63  ;;  %v1296_v7 = vmul.f32 0.015625, %v1279_v48  ;;  %v1295_v19 = vmul.f32 0.015625, %v1277_v58 }
 0x458   : > { %v1412_v1 = vmul.f32 0.70710677, %v1380_v51  ;;  %v2529_v6 = vpop.eup %2528  ;;  %v1359_v2 = vmul.f32 %v3381_v49, %v1336_v18  ;;  %v1360_v24 = vmul.f32 %v3381_v49, %v1337_v41  ;;  %v1395_v45 = vmul.f32 0.5, %v3402_v43 }
 0x459   : > { %v2531_v10 = vpop.eup %2530  ;;  %v1339_v15 = vmul.f32 %v2529_v6, %v3278_v32  ;;  %v1312_v26 = vadd.f32 1e-05, %v1296_v7  ;;  %v1311_v16 = vadd.f32 1e-05, %v1295_v19  ;;  %v1392_v32 = vmul.f32 0.5, %v3395_v12 }
 0x45a   : > { %2546 = verf.f32 %v1412_v1  ;;  %v3424_v17 = vadd.f32 %v3388_v3, %v1359_v2  ;;  %v1281_v22 = vpop.xlane.xlu1 %1280  ;;  %v3427_v57 = vadd.f32 %v3388_v3, %v1360_v24  ;;  %v1338_v23 = vmul.f32 %v2531_v10, %v3284_v33 }
 0x45b   : > { %v2533_v53 = vpop.eup %2532  ;;  %2548 = verf.f32 %v1413_v39  ;;  %v1362_v25 = vmul.f32 %v3381_v49, %v1339_v15  ;;  %v1297_v13 = vmul.f32 0.015625, %v1281_v22  ;;  %v1396_v59 = vmul.f32 0.5, %v1380_v51 }
 0x45c   : > { %v2535_v60 = vpop.eup %2534  ;;  %v1441_v54 = vadd.f32 1.0, %v2533_v53  ;;  %2550 = vrsqrt.f32 %v1312_v26  ;;  %v1414_v29 = vmul.f32 0.70710677, %v3424_v17  ;;  %v1415_v28 = vmul.f32 0.70710677, %v3427_v57 }
 0x45d   : > { %v1440_v27 = vadd.f32 1.0, %v2535_v60  ;;  %v2537_v0 = vpop.eup %2536  ;;  %2552 = vrsqrt.f32 %v1311_v16  ;;  %v1313_v30 = vadd.f32 1e-05, %v1297_v13  ;;  %v1361_v40 = vmul.f32 %v3381_v49, %v1338_v23 }
 0x45e   : > { %v1457_v31 = vmul.f32 %v1441_v54, %v1393_v38  ;;  %v2539_v34 = vpop.eup %2538  ;;  %2554 = verf.f32 %v1414_v29  ;;  %v3436_v4 = vadd.f32 %v3388_v3, %v1362_v25  ;;  %v1341_v9 = vmul.f32 %v2537_v0, %v3292_v47 }
 0x45f   : > { %v1456_v42 = vmul.f32 %v1440_v27, %v1392_v32  ;;  %v2541_v33 = vpop.eup %2540  ;;  %v1340_v12 = vmul.f32 %v2539_v34, %v3298_v8  ;;  %2556 = vrsqrt.f32 %v1313_v30  ;;  %v1384_v36 = vadd.f32 %v3388_v3, %v1361_v40 }
 0x460   : > { %v2543_v46 = vpop.eup %2542  ;;  %v1443_v55 = vadd.f32 1.0, %v2541_v33  ;;  %2558 = verf.f32 %v1415_v28  ;;  %v1417_v44 = vmul.f32 0.70710677, %v3436_v4  ;;  %v1364_v41 = vmul.f32 %v3381_v49, %v1341_v9 }
 0x461   : > { %2295 = vmatprep.mubr.f32.mxu0 %v1456_v42  ;;  %v1442_v37 = vadd.f32 1.0, %v2543_v46  ;;  %v2545_v14 = vpop.eup %2544  ;;  %v1416_v8 = vmul.f32 0.70710677, %v1384_v36  ;;  %v1363_v47 = vmul.f32 %v3381_v49, %v1340_v12  ;;  %v1397_v7 = vmul.f32 0.5, %v3415_v62 }
 0x462   : > { %2296 = vmatmul.mubr.f32.vlgmr.msra.gmra.mrb[16].mxu0 %v1457_v31  ;;  %2560 = verf.f32 %v1417_v44  ;;  %v1342_v63 = vmul.f32 %v2545_v14, %v3311_v61  ;;  %v1459_v35 = vmul.f32 %v1443_v55, %v1395_v45  ;;  %v1387_v43 = vadd.f32 %v3388_v3, %v1364_v41 }
 0x463   : > { %v1458_v52 = vmul.f32 %v1442_v37, %v1394_v50  ;;  %2562 = verf.f32 %v1416_v8  ;;  %v1386_v58 = vadd.f32 %v3388_v3, %v1363_v47  ;;  %v1398_v60 = vmul.f32 0.5, %v3424_v17 }
 0x464   : > { %v2547_v21 = vpop.eup %2546  ;;  %v1365_v51 = vmul.f32 %v3381_v49, %v1342_v63  ;;  %v1419_v61 = vmul.f32 0.70710677, %v1387_v43  ;;  %v1399_v13 = vmul.f32 0.5, %v3427_v57  ;;  %v1400_v42 = vmul.f32 0.5, %v1384_v36 }
 0x465   : > { %v2549_v18 = vpop.eup %2548  ;;  %v1444_v48 = vadd.f32 1.0, %v2547_v21  ;;  %2298 = vmatprep.mubr.f32.mxu0 %v1458_v52  ;;  %v1418_v19 = vmul.f32 0.70710677, %v1386_v58  ;;  %v1401_v40 = vmul.f32 0.5, %v3436_v4  ;;  %v1402_v55 = vmul.f32 0.5, %v1386_v58 }
 0x466   : > { %v1445_v1 = vadd.f32 1.0, %v2549_v18  ;;  %v2551_v39 = vpop.eup %2550  ;;  %2299 = vmatmul.mubr.f32.gmra.mrb[18].mxu0 %v1459_v35  ;;  %v1388_v10 = vadd.f32 %v3388_v3, %v1365_v51  ;;  %v1403_v36 = vmul.f32 0.5, %v1387_v43  ;;  %v2082_v51 = vld [vmem:[%s3776_s6] ss:$0 sm:$0xff] }
 0x467   : > { %v1460_v6 = vmul.f32 %v1444_v48, %v1396_v59  ;;  %v2553_v2 = vpop.eup %2552  ;;  %2564 = verf.f32 %v1418_v19  ;;  %v1344_v15 = vmul.f32 %v2551_v39, %v3325_v5 }
 0x468   : > { %v1461_v38 = vmul.f32 %v1445_v1, %v1397_v7  ;;  %v1343_v24 = vmul.f32 %v2553_v2, %v3329_v20  ;;  %v2555_v53 = vpop.eup %2554  ;;  %2566 = verf.f32 %v1419_v61  ;;  %v1420_v26 = vmul.f32 0.70710677, %v1388_v10 }
 0x469   : > { %2301 = vmatprep.mubr.f32.mxu0 %v1460_v6  ;;  %v2557_v16 = vpop.eup %2556  ;;  %v1446_v62 = vadd.f32 1.0, %v2555_v53  ;;  %v1367_v54 = vmul.f32 %v3381_v49, %v1344_v15  ;;  %v1404_v45 = vmul.f32 0.5, %v1388_v10 }
 0x46a   : > { %2302 = vmatmul.mubr.f32.gmra.mrb[20].mxu0 %v1461_v38  ;;  %v1366_v22 = vmul.f32 %v3381_v49, %v1343_v24  ;;  %v2559_v23 = vpop.eup %2558  ;;  %v1345_v25 = vmul.f32 %v2557_v16, %v3344_v11  ;;  %2568 = verf.f32 %v1420_v26 }
 0x46b   : > { %v1462_v20 = vmul.f32 %v1446_v62, %v1398_v60  ;;  %v1447_v5 = vadd.f32 1.0, %v2559_v23  ;;  %v1390_v27 = vadd.f32 %v3388_v3, %v1367_v54 }
 0x46c   : > { %v1389_v32 = vadd.f32 %v3388_v3, %v1366_v22  ;;  %v2561_v0 = vpop.eup %2560  ;;  %v1368_v17 = vmul.f32 %v3381_v49, %v1345_v25 }
 0x46d   : > { %v2563_v31 = vpop.eup %2562  ;;  %2304 = vmatprep.mubr.f32.mxu0 %v1462_v20  ;;  %v1463_v29 = vmul.f32 %v1447_v5, %v1399_v13  ;;  %v1449_v34 = vadd.f32 1.0, %v2561_v0  ;;  %v1422_v11 = vmul.f32 0.70710677, %v1390_v27  ;;  %v1406_v41 = vmul.f32 0.5, %v1390_v27 }
 0x46e   : > { %v1421_v30 = vmul.f32 0.70710677, %v1389_v32  ;;  %v1448_v28 = vadd.f32 1.0, %v2563_v31  ;;  %v1391_v57 = vadd.f32 %v3388_v3, %v1368_v17  ;;  %v1405_v21 = vmul.f32 0.5, %v1389_v32 }
 0x46f   : > { %2305 = vmatmul.mubr.f32.gmra.mrb[22].mxu0 %v1463_v29  ;;  %v1465_v46 = vmul.f32 %v1449_v34, %v1401_v40 }
 0x470   : > { %2570 = verf.f32 %v1421_v30  ;;  %v1464_v33 = vmul.f32 %v1448_v28, %v1400_v42  ;;  %v1423_v12 = vmul.f32 0.70710677, %v1391_v57  ;;  %v1407_v58 = vmul.f32 0.5, %v1391_v57 }
 0x471   : > { %2572 = verf.f32 %v1422_v11  ;;  %v2565_v9 = vpop.eup %2564 }
 0x472   : > { %v2567_v49 = vpop.eup %2566  ;;  %2307 = vmatprep.mubr.f32.mxu0 %v1464_v33  ;;  %v1450_v50 = vadd.f32 1.0, %v2565_v9  ;;  %2574 = verf.f32 %v1423_v12 }
 0x473   : > { %2308 = vmatmul.mubr.f32.gmra.mrb[24].mxu0 %v1465_v46  ;;  %v1451_v37 = vadd.f32 1.0, %v2567_v49 }
 0x474   : > { %v2569_v44 = vpop.eup %2568  ;;  %v1466_v14 = vmul.f32 %v1450_v50, %v1402_v55 }
 0x475   : > { %v1467_v3 = vmul.f32 %v1451_v37, %v1403_v36  ;;  %v1452_v59 = vadd.f32 1.0, %v2569_v44 }
 0x476   : > { %2310 = vmatprep.mubr.f32.mxu0 %v1466_v14 }
 0x477   : > { %2311 = vmatmul.mubr.f32.gmra.mrb[26].mxu0 %v1467_v3  ;;  %v1468_v4 = vmul.f32 %v1452_v59, %v1404_v45 }
 0x479   : > { %2313 = vmatprep.mubr.f32.mxu0 %v1468_v4 }
 0x47a   : > { %v2571_v8 = vpop.eup %2570 }
 0x47b   : > { %v2573_v47 = vpop.eup %2572  ;;  %v1453_v52 = vadd.f32 1.0, %v2571_v8 }
 0x47c   : > { %v1454_v63 = vadd.f32 1.0, %v2573_v47  ;;  %v2575_v18 = vpop.eup %2574 }
 0x47d   : > { %v1469_v35 = vmul.f32 %v1453_v52, %v1405_v21  ;;  %v1455_v1 = vadd.f32 1.0, %v2575_v18 }
 0x47e   : > { %v1470_v48 = vmul.f32 %v1454_v63, %v1406_v41 }
 0x47f   : > { %2314 = vmatmul.mubr.f32.gmra.mrb[28].mxu0 %v1469_v35  ;;  %v1471_v43 = vmul.f32 %v1455_v1, %v1407_v58 }
 0x480   : > { %2316 = vmatprep.mubr.f32.mxu1 %v1470_v48 }
 0x481   : > { %2317 = vmatmul.mubr.f32.vlgmr.msra.gmra.mrb[16].mxu1 %v1471_v43 }
 0x535   : > { %v2297_v39 = vpop.f32.mrb[16].mxu0 }
 0x536   : > { %v1567_v6 = vadd.f32 %v2297_v39, %v2082_v51  ;;  %v1561_v7 = vpop.f32.mrb[17].mxu0 }
 0x537   : > { %v1562_v19 = vadd.f32 %v2082_v51, %v1561_v7 }
 0x538   : > { %1642 = vadd.xlane.f32.xlu1 %v1567_v6 }
 0x539   : > { %1640 = vadd.xlane.f32.xlu0 %v1562_v19  ;;  %v2300_v2 = vpop.f32.mrb[18].mxu0 }
 0x53a   : > { %v3467_v61 = vadd.f32 %v2300_v2, %v2082_v51  ;;  %v1571_v10 = vpop.f32.mrb[19].mxu0 }
 0x53b   : > { %v3469_v38 = vadd.f32 %v2082_v51, %v1571_v10 }
 0x53c   : > { %1646 = vadd.xlane.f32.xlu1 %v3467_v61 }
 0x53d   : > { %1644 = vadd.xlane.f32.xlu0 %v3469_v38  ;;  %v2303_v24 = vpop.f32.mrb[20].mxu0 }
 0x53e   : > { %v3473_v15 = vadd.f32 %v2303_v24, %v2082_v51  ;;  %v1581_v53 = vpop.f32.mrb[21].mxu0 }
 0x53f   : > { %v3475_v26 = vadd.f32 %v2082_v51, %v1581_v53 }
 0x540   : > { %1650 = vadd.xlane.f32.xlu1 %v3473_v15 }
 0x541   : > { %1648 = vadd.xlane.f32.xlu0 %v3475_v26 }
 0x542   : > { %v2306_v16 = vpop.f32.mrb[22].mxu0 }
 0x543   : > { %v3479_v60 = vadd.f32 %v2306_v16, %v2082_v51  ;;  %v1591_v62 = vpop.f32.mrb[23].mxu0 }
 0x544   : > { %v3481_v22 = vadd.f32 %v2082_v51, %v1591_v62 }
 0x545   : > { %1654 = vadd.xlane.f32.xlu1 %v3479_v60 }
 0x546   : > { %1652 = vadd.xlane.f32.xlu0 %v3481_v22  ;;  %v2309_v54 = vpop.f32.mrb[24].mxu0 }
 0x547   : > { %v3485_v23 = vadd.f32 %v2309_v54, %v2082_v51  ;;  %v1601_v25 = vpop.f32.mrb[25].mxu0 }
 0x548   : > { %v3487_v13 = vadd.f32 %v2082_v51, %v1601_v25 }
 0x549   : > { %1658 = vadd.xlane.f32.xlu1 %v3485_v23 }
 0x54a   : > { %1656 = vadd.xlane.f32.xlu0 %v3487_v13  ;;  %v2312_v20 = vpop.f32.mrb[26].mxu0 }
 0x54b   : > { %v3491_v5 = vadd.f32 %v2312_v20, %v2082_v51  ;;  %v1611_v32 = vpop.f32.mrb[27].mxu0 }
 0x54c   : > { %v3493_v27 = vadd.f32 %v2082_v51, %v1611_v32 }
 0x54d   : > { %1662 = vadd.xlane.f32.xlu1 %v3491_v5 }
 0x54e   : > { %1660 = vadd.xlane.f32.xlu0 %v3493_v27 }
 0x552   : > { %v2315_v0 = vpop.f32.mrb[28].mxu0 }
 0x553   : > { %v3497_v17 = vadd.f32 %v2315_v0, %v2082_v51  ;;  %v1621_v31 = vpop.f32.mrb[29].mxu0 }
 0x554   : > { %v3499_v29 = vadd.f32 %v2082_v51, %v1621_v31  ;;  %v2318_v34 = vpop.f32.mrb[16].mxu1 }
 0x555   : > { %1666 = vadd.xlane.f32.xlu1 %v3497_v17  ;;  %v3502_v30 = vadd.f32 %v2318_v34, %v2082_v51  ;;  %v1631_v42 = vpop.f32.mrb[17].mxu1 }
 0x556   : > { %1664 = vadd.xlane.f32.xlu0 %v3499_v29  ;;  %v3505_v28 = vadd.f32 %v2082_v51, %v1631_v42 }
 0x559   : > { %1670 = vadd.xlane.f32.xlu1 %v3502_v30 }
 0x55a   : > { %1668 = vadd.xlane.f32.xlu0 %v3505_v28 }
 0x5c5   : > { %v1643_v11 = vpop.xlane.xlu1 %1642 }
 0x5c6   : > { %v1673_v57 = vmul.f32 0.0625, %v1643_v11  ;;  %v1641_v40 = vpop.xlane.xlu0 %1640 }
 0x5c7   : > { %v1672_v33 = vmul.f32 0.0625, %v1641_v40 }
 0x5c8   : > { %v1690_v12 = vsub.f32 %v1567_v6, %v1673_v57 }
 0x5c9   : > { %v1689_v9 = vsub.f32 %v1562_v19, %v1672_v33  ;;  %v1647_v46 = vpop.xlane.xlu1 %1646 }
 0x5ca   : > { %v3512_v49 = vsel %vm1688_vm2, %v1690_v12, 0.0  ;;  %v1675_v55 = vmul.f32 0.0625, %v1647_v46  ;;  %v1645_v50 = vpop.xlane.xlu0 %1644 }
 0x5cb   : > { %v1724_v36 = vmul.f32 %v3512_v49, %v3512_v49  ;;  %v3518_v37 = vsel %vm1688_vm2, %v1689_v9, 0.0  ;;  %v1674_v44 = vmul.f32 0.0625, %v1645_v50 }
 0x5cc   : > { %v1723_v14 = vmul.f32 %v3518_v37, %v3518_v37  ;;  %v1692_v3 = vsub.f32 %v3467_v61, %v1675_v55 }
 0x5cd   : > { %1741 = vadd.xlane.f32.xlu1 %v1724_v36  ;;  %v1691_v45 = vsub.f32 %v3469_v38, %v1674_v44  ;;  %v1651_v59 = vpop.xlane.xlu1 %1650 }
 0x5ce   : > { %1739 = vadd.xlane.f32.xlu0 %v1723_v14  ;;  %v1677_v4 = vmul.f32 0.0625, %v1651_v59  ;;  %v1649_v8 = vpop.xlane.xlu0 %1648  ;;  %v3526_v47 = vsel %vm1688_vm2, %v1692_v3, 0.0 }
 0x5cf   : > { %v1676_v21 = vmul.f32 0.0625, %v1649_v8  ;;  %v1726_v52 = vmul.f32 %v3526_v47, %v3526_v47  ;;  %v3532_v41 = vsel %vm1688_vm2, %v1691_v45, 0.0 }
 0x5d0   : > { %v1694_v63 = vsub.f32 %v3473_v15, %v1677_v4  ;;  %v1725_v18 = vmul.f32 %v3532_v41, %v3532_v41 }
 0x5d1   : > { %v1693_v35 = vsub.f32 %v3475_v26, %v1676_v21  ;;  %1745 = vadd.xlane.f32.xlu1 %v1726_v52 }
 0x5d2   : > { %1743 = vadd.xlane.f32.xlu0 %v1725_v18  ;;  %v3540_v48 = vsel %vm1688_vm2, %v1694_v63, 0.0  ;;  %v1655_v58 = vpop.xlane.xlu1 %1654 }
 0x5d3   : > { %v1728_v1 = vmul.f32 %v3540_v48, %v3540_v48  ;;  %v3546_v43 = vsel %vm1688_vm2, %v1693_v35, 0.0  ;;  %v1679_v51 = vmul.f32 0.0625, %v1655_v58  ;;  %v1653_v39 = vpop.xlane.xlu0 %1652 }
 0x5d4   : > { %v1727_v6 = vmul.f32 %v3546_v43, %v3546_v43  ;;  %v1678_v7 = vmul.f32 0.0625, %v1653_v39 }
 0x5d5   : > { %1749 = vadd.xlane.f32.xlu1 %v1728_v1  ;;  %v1696_v19 = vsub.f32 %v3479_v60, %v1679_v51 }
 0x5d6   : > { %1747 = vadd.xlane.f32.xlu0 %v1727_v6  ;;  %v1695_v2 = vsub.f32 %v3481_v22, %v1678_v7  ;;  %v1659_v61 = vpop.xlane.xlu1 %1658 }
 0x5d7   : > { %v1681_v10 = vmul.f32 0.0625, %v1659_v61  ;;  %v1657_v38 = vpop.xlane.xlu0 %1656  ;;  %v3554_v24 = vsel %vm1688_vm2, %v1696_v19, 0.0 }
 0x5d8   : > { %v1680_v15 = vmul.f32 0.0625, %v1657_v38  ;;  %v1730_v53 = vmul.f32 %v3554_v24, %v3554_v24  ;;  %v3560_v26 = vsel %vm1688_vm2, %v1695_v2, 0.0 }
 0x5d9   : > { %v1698_v16 = vsub.f32 %v3485_v23, %v1681_v10  ;;  %v1729_v60 = vmul.f32 %v3560_v26, %v3560_v26 }
 0x5da   : > { %v1697_v62 = vsub.f32 %v3487_v13, %v1680_v15  ;;  %v1663_v22 = vpop.xlane.xlu1 %1662  ;;  %1753 = vadd.xlane.f32.xlu1 %v1730_v53 }
 0x5db   : > { %v1683_v54 = vmul.f32 0.0625, %v1663_v22  ;;  %1751 = vadd.xlane.f32.xlu0 %v1729_v60  ;;  %v1661_v25 = vpop.xlane.xlu0 %1660  ;;  %v3568_v20 = vsel %vm1688_vm2, %v1698_v16, 0.0  ;;  %v3623_v16 = vld [vmem:[%s3779_s9] ss:$0 sm:$0xff] }
 0x5dc   : > { %v1682_v32 = vmul.f32 0.0625, %v1661_v25  ;;  %v1732_v0 = vmul.f32 %v3568_v20, %v3568_v20  ;;  %v3574_v23 = vsel %vm1688_vm2, %v1697_v62, 0.0 }
 0x5dd   : > { %v1700_v31 = vsub.f32 %v3491_v5, %v1683_v54  ;;  %v1731_v13 = vmul.f32 %v3574_v23, %v3574_v23 }
 0x5de   : > { %v1699_v34 = vsub.f32 %v3493_v27, %v1682_v32  ;;  %1757 = vadd.xlane.f32.xlu1 %v1732_v0  ;;  %v3629_v32 = vld [vmem:[%s3782_s12] ss:$0 sm:$0xff] }
 0x5df   : > { %1755 = vadd.xlane.f32.xlu0 %v1731_v13  ;;  %v3582_v42 = vsel %vm1688_vm2, %v1700_v31, 0.0 }
 0x5e0   : > { %v1734_v11 = vmul.f32 %v3582_v42, %v3582_v42  ;;  %v3588_v57 = vsel %vm1688_vm2, %v1699_v34, 0.0 }
 0x5e1   : > { %v1733_v5 = vmul.f32 %v3588_v57, %v3588_v57 }
 0x5e2   : > { %v1667_v40 = vpop.xlane.xlu1 %1666  ;;  %1761 = vadd.xlane.f32.xlu1 %v1734_v11 }
 0x5e3   : > { %v1685_v33 = vmul.f32 0.0625, %v1667_v40  ;;  %v1665_v27 = vpop.xlane.xlu0 %1664  ;;  %1759 = vadd.xlane.f32.xlu0 %v1733_v5 }
 0x5e4   : > { %v1684_v12 = vmul.f32 0.0625, %v1665_v27 }
 0x5e5   : > { %v1702_v9 = vsub.f32 %v3497_v17, %v1685_v33 }
 0x5e6   : > { %v1701_v46 = vsub.f32 %v3499_v29, %v1684_v12  ;;  %v1671_v55 = vpop.xlane.xlu1 %1670 }
 0x5e7   : > { %v1687_v50 = vmul.f32 0.0625, %v1671_v55  ;;  %v1669_v36 = vpop.xlane.xlu0 %1668  ;;  %v3596_v44 = vsel %vm1688_vm2, %v1702_v9, 0.0 }
 0x5e8   : > { %v1686_v14 = vmul.f32 0.0625, %v1669_v36  ;;  %v1736_v3 = vmul.f32 %v3596_v44, %v3596_v44  ;;  %v3602_v45 = vsel %vm1688_vm2, %v1701_v46, 0.0 }
 0x5e9   : > { %v1704_v59 = vsub.f32 %v3502_v30, %v1687_v50  ;;  %v1735_v17 = vmul.f32 %v3602_v45, %v3602_v45 }
 0x5ea   : > { %v1703_v29 = vsub.f32 %v3505_v28, %v1686_v14  ;;  %1765 = vadd.xlane.f32.xlu1 %v1736_v3 }
 0x5eb   : > { %1763 = vadd.xlane.f32.xlu0 %v1735_v17  ;;  %v3610_v4 = vsel %vm1688_vm2, %v1704_v59, 0.0 }
 0x5ec   : > { %v1738_v8 = vmul.f32 %v3610_v4, %v3610_v4  ;;  %v3616_v21 = vsel %vm1688_vm2, %v1703_v29, 0.0 }
 0x5ed   : > { %v1737_v30 = vmul.f32 %v3616_v21, %v3616_v21 }
 0x5ee   : > { %1769 = vadd.xlane.f32.xlu1 %v1738_v8 }
 0x5ef   : > { %1767 = vadd.xlane.f32.xlu0 %v1737_v30 }
 0x65a   : > { %v1742_v52 = vpop.xlane.xlu1 %1741 }
 0x65b   : > { %v1772_v28 = vmul.f32 0.0625, %v1742_v52  ;;  %v1740_v63 = vpop.xlane.xlu0 %1739 }
 0x65c   : > { %v1771_v18 = vmul.f32 0.0625, %v1740_v63 }
 0x65d   : > { %v1788_v35 = vadd.f32 1e-05, %v1772_v28 }
 0x65e   : > { %v1787_v58 = vadd.f32 1e-05, %v1771_v18  ;;  %v1746_v1 = vpop.xlane.xlu1 %1745 }
 0x65f   : > { %2576 = vrsqrt.f32 %v1788_v35  ;;  %v1774_v51 = vmul.f32 0.0625, %v1746_v1  ;;  %v1744_v39 = vpop.xlane.xlu0 %1743 }
 0x660   : > { %2578 = vrsqrt.f32 %v1787_v58  ;;  %v1773_v6 = vmul.f32 0.0625, %v1744_v39 }
 0x661   : > { %v1790_v56 = vadd.f32 1e-05, %v1774_v51 }
 0x662   : > { %v1789_v7 = vadd.f32 1e-05, %v1773_v6  ;;  %v1750_v19 = vpop.xlane.xlu1 %1749 }
 0x663   : > { %2580 = vrsqrt.f32 %v1790_v56  ;;  %v1776_v2 = vmul.f32 0.0625, %v1750_v19  ;;  %v1748_v61 = vpop.xlane.xlu0 %1747 }
 0x664   : > { %2582 = vrsqrt.f32 %v1789_v7  ;;  %v1775_v10 = vmul.f32 0.0625, %v1748_v61 }
 0x665   : > { %v1792_v38 = vadd.f32 1e-05, %v1776_v2 }
 0x666   : > { %v1791_v15 = vadd.f32 1e-05, %v1775_v10 }
 0x667   : > { %2584 = vrsqrt.f32 %v1792_v38  ;;  %v1754_v60 = vpop.xlane.xlu1 %1753 }
 0x668   : > { %2586 = vrsqrt.f32 %v1791_v15  ;;  %v1778_v54 = vmul.f32 0.0625, %v1754_v60  ;;  %v1752_v25 = vpop.xlane.xlu0 %1751 }
 0x669   : > { %v2577_v53 = vpop.eup %2576  ;;  %v1777_v31 = vmul.f32 0.0625, %v1752_v25 }
 0x66a   : > { %v2579_v62 = vpop.eup %2578  ;;  %v1820_v22 = vmul.f32 %v2577_v53, %v3512_v49  ;;  %v1794_v34 = vadd.f32 1e-05, %v1778_v54 }
 0x66b   : > { %v1819_v0 = vmul.f32 %v2579_v62, %v3518_v37  ;;  %v1793_v40 = vadd.f32 1e-05, %v1777_v31  ;;  %v1758_v5 = vpop.xlane.xlu1 %1757 }
 0x66c   : > { %v1843_v13 = vmul.f32 %v3623_v16, %v1820_v22  ;;  %2588 = vrsqrt.f32 %v1794_v34  ;;  %v1780_v27 = vmul.f32 0.0625, %v1758_v5  ;;  %v1756_v12 = vpop.xlane.xlu0 %1755 }
 0x66d   : > { %v1842_v11 = vmul.f32 %v3623_v16, %v1819_v0  ;;  %v2581_v33 = vpop.eup %2580  ;;  %2590 = vrsqrt.f32 %v1793_v40  ;;  %v1779_v37 = vmul.f32 0.0625, %v1756_v12 }
 0x66e   : > { %v1866_v49 = vadd.f32 %v3629_v32, %v1843_v13  ;;  %v2583_v9 = vpop.eup %2582  ;;  %v1822_v55 = vmul.f32 %v2581_v33, %v3526_v47  ;;  %v1796_v14 = vadd.f32 1e-05, %v1780_v27 }
 0x66f   : > { %v1865_v46 = vadd.f32 %v3629_v32, %v1842_v11  ;;  %v1821_v36 = vmul.f32 %v2583_v9, %v3532_v41  ;;  %v1795_v17 = vadd.f32 1e-05, %v1779_v37  ;;  %v1762_v29 = vpop.xlane.xlu1 %1761 }
 0x670   : > { %v1898_v50 = vmul.f32 0.70710677, %v1866_v49  ;;  %v1845_v59 = vmul.f32 %v3623_v16, %v1822_v55  ;;  %v1782_v52 = vmul.f32 0.0625, %v1762_v29  ;;  %v1760_v28 = vpop.xlane.xlu0 %1759  ;;  %v1882_v0 = vmul.f32 0.5, %v1866_v49 }
 0x671   : > { %v1897_v3 = vmul.f32 0.70710677, %v1865_v46  ;;  %v2585_v8 = vpop.eup %2584  ;;  %v1844_v30 = vmul.f32 %v3623_v16, %v1821_v36  ;;  %v1781_v41 = vmul.f32 0.0625, %v1760_v28  ;;  %v1881_v40 = vmul.f32 0.5, %v1865_v46 }
 0x672   : > { %2592 = verf.f32 %v1898_v50  ;;  %v2587_v63 = vpop.eup %2586  ;;  %v1868_v47 = vadd.f32 %v3629_v32, %v1845_v59  ;;  %v1824_v18 = vmul.f32 %v2585_v8, %v3540_v48  ;;  %v1798_v1 = vadd.f32 1e-05, %v1782_v52 }
 0x673   : > { %2594 = verf.f32 %v1897_v3  ;;  %v1867_v35 = vadd.f32 %v3629_v32, %v1844_v30  ;;  %v1823_v58 = vmul.f32 %v2587_v63, %v3546_v43  ;;  %v1797_v7 = vadd.f32 1e-05, %v1781_v41 }
 0x674   : > { %2596 = vrsqrt.f32 %v1796_v14  ;;  %v1900_v51 = vmul.f32 0.70710677, %v1868_v47  ;;  %v1847_v39 = vmul.f32 %v3623_v16, %v1824_v18  ;;  %v1884_v12 = vmul.f32 0.5, %v1868_v47 }
 0x675   : > { %2598 = vrsqrt.f32 %v1795_v17  ;;  %v1899_v6 = vmul.f32 0.70710677, %v1867_v35  ;;  %v1846_v56 = vmul.f32 %v3623_v16, %v1823_v58  ;;  %v1883_v59 = vmul.f32 0.5, %v1867_v35 }
 0x676   : > { %2600 = vrsqrt.f32 %v1798_v1  ;;  %v3647_v48 = vadd.f32 %v3629_v32, %v1847_v39  ;;  %v2589_v19 = vpop.eup %2588 }
 0x677   : > { %2602 = verf.f32 %v1900_v51  ;;  %v3651_v43 = vadd.f32 %v3629_v32, %v1846_v56  ;;  %v1766_v2 = vpop.xlane.xlu1 %1765  ;;  %v2591_v61 = vpop.eup %2590  ;;  %v1826_v38 = vmul.f32 %v2589_v19, %v3554_v24 }
 0x678   : > { %2604 = verf.f32 %v1899_v6  ;;  %v1902_v10 = vmul.f32 0.70710677, %v3647_v48  ;;  %v1764_v15 = vpop.xlane.xlu0 %1763  ;;  %v1825_v60 = vmul.f32 %v2591_v61, %v3560_v26  ;;  %v1784_v62 = vmul.f32 0.0625, %v1766_v2 }
 0x679   : > { %2606 = vrsqrt.f32 %v1797_v7  ;;  %v1901_v53 = vmul.f32 0.70710677, %v3651_v43  ;;  %v1849_v22 = vmul.f32 %v3623_v16, %v1826_v38  ;;  %v1783_v54 = vmul.f32 0.0625, %v1764_v15 }
 0x67a   : > { %2608 = verf.f32 %v1902_v10  ;;  %v1848_v31 = vmul.f32 %v3623_v16, %v1825_v60  ;;  %v1800_v24 = vadd.f32 1e-05, %v1784_v62  ;;  %v1886_v56 = vmul.f32 0.5, %v3647_v48 }
 0x67b   : > { %2610 = verf.f32 %v1901_v53  ;;  %v1770_v13 = vpop.xlane.xlu1 %1769  ;;  %v3664_v26 = vadd.f32 %v3629_v32, %v1849_v22  ;;  %v1799_v36 = vadd.f32 1e-05, %v1783_v54 }
 0x67c   : > { %v2593_v25 = vpop.eup %2592  ;;  %v1786_v5 = vmul.f32 0.0625, %v1770_v13  ;;  %v3667_v9 = vadd.f32 %v3629_v32, %v1848_v31  ;;  %2612 = vrsqrt.f32 %v1800_v24  ;;  %v1768_v46 = vpop.xlane.xlu0 %1767 }
 0x67d   : > { %v2595_v34 = vpop.eup %2594  ;;  %v1930_v11 = vadd.f32 1.0, %v2593_v25  ;;  %v1904_v37 = vmul.f32 0.70710677, %v3664_v26  ;;  %v1785_v18 = vmul.f32 0.0625, %v1768_v46  ;;  %v1888_v13 = vmul.f32 0.5, %v3664_v26 }
 0x67e   : > { %v2597_v33 = vpop.eup %2596  ;;  %v1929_v27 = vadd.f32 1.0, %v2595_v34  ;;  %v1903_v17 = vmul.f32 0.70710677, %v3667_v9  ;;  %v1802_v52 = vadd.f32 1e-05, %v1786_v5 }
 0x67f   : > { %v2599_v49 = vpop.eup %2598  ;;  %v1946_v55 = vmul.f32 %v1930_v11, %v1882_v0  ;;  %v1828_v50 = vmul.f32 %v2597_v33, %v3568_v20  ;;  %2614 = verf.f32 %v1904_v37  ;;  %v1801_v15 = vadd.f32 1e-05, %v1785_v18 }
 0x680   : > { %v2601_v14 = vpop.eup %2600  ;;  %v1945_v3 = vmul.f32 %v1929_v27, %v1881_v40  ;;  %v1827_v29 = vmul.f32 %v2599_v49, %v3574_v23  ;;  %2616 = verf.f32 %v1903_v17  ;;  %v1887_v40 = vmul.f32 0.5, %v3667_v9 }
 0x681   : > { %v2603_v8 = vpop.eup %2602  ;;  %1962 = vst [vmem:[%s3674_s15 + $0x8] sm:$0xff] %v1946_v55  ;;  %v1851_v30 = vmul.f32 %v3623_v16, %v1828_v50  ;;  %v1830_v20 = vmul.f32 %v2601_v14, %v3582_v42  ;;  %2618 = vrsqrt.f32 %v1799_v36 }
 0x682   : > { %v2605_v28 = vpop.eup %2604  ;;  %1961 = vst [vmem:[%s3674_s15] sm:$0xff] %v1945_v3  ;;  %v1932_v63 = vadd.f32 1.0, %v2603_v8  ;;  %v1850_v47 = vmul.f32 %v3623_v16, %v1827_v29  ;;  %2620 = vrsqrt.f32 %v1802_v52 }
 0x683   : > { %v2607_v23 = vpop.eup %2606  ;;  %v1931_v41 = vadd.f32 1.0, %v2605_v28  ;;  %v1874_v35 = vadd.f32 %v3629_v32, %v1851_v30  ;;  %v1853_v58 = vmul.f32 %v3623_v16, %v1830_v20 }
 0x684   : > { %v1948_v1 = vmul.f32 %v1932_v63, %v1884_v12  ;;  %v1873_v42 = vadd.f32 %v3629_v32, %v1850_v47  ;;  %v1829_v51 = vmul.f32 %v2607_v23, %v3588_v57  ;;  %v2609_v39 = vpop.eup %2608  ;;  %v1885_v57 = vmul.f32 0.5, %v3651_v43 }
 0x685   : > { %v1947_v6 = vmul.f32 %v1931_v41, %v1883_v59  ;;  %v1906_v7 = vmul.f32 0.70710677, %v1874_v35  ;;  %v1876_v19 = vadd.f32 %v3629_v32, %v1853_v58  ;;  %v2611_v2 = vpop.eup %2610  ;;  %v1934_v61 = vadd.f32 1.0, %v2609_v39 }
 0x686   : > { %1964 = vst [vmem:[%s3674_s15 + $0x18] sm:$0xff] %v1948_v1  ;;  %v1905_v10 = vmul.f32 0.70710677, %v1873_v42  ;;  %v1852_v38 = vmul.f32 %v3623_v16, %v1829_v51  ;;  %v1933_v53 = vadd.f32 1.0, %v2611_v2  ;;  %v2613_v62 = vpop.eup %2612  ;;  %v1890_v46 = vmul.f32 0.5, %v1874_v35 }
 0x687   : > { %1963 = vst [vmem:[%s3674_s15 + $0x10] sm:$0xff] %v1947_v6  ;;  %2622 = verf.f32 %v1906_v7  ;;  %v1908_v60 = vmul.f32 0.70710677, %v1876_v19  ;;  %v1950_v48 = vmul.f32 %v1934_v61, %v1886_v56  ;;  %v1832_v25 = vmul.f32 %v2613_v62, %v3596_v44 }
 0x688   : > { %2624 = verf.f32 %v1905_v10  ;;  %v1875_v22 = vadd.f32 %v3629_v32, %v1852_v38  ;;  %v1949_v54 = vmul.f32 %v1933_v53, %v1885_v57  ;;  %v1892_v30 = vmul.f32 0.5, %v1876_v19 }
 0x689   : > { %2626 = verf.f32 %v1908_v60  ;;  %1966 = vst [vmem:[%s3674_s15 + $0x28] sm:$0xff] %v1950_v48  ;;  %v2615_v31 = vpop.eup %2614  ;;  %v1855_v43 = vmul.f32 %v3623_v16, %v1832_v25 }
 0x68a   : > { %v1907_v0 = vmul.f32 0.70710677, %v1875_v22  ;;  %2628 = vrsqrt.f32 %v1801_v15  ;;  %1965 = vst [vmem:[%s3674_s15 + $0x20] sm:$0xff] %v1949_v54  ;;  %v2617_v24 = vpop.eup %2616  ;;  %v1936_v34 = vadd.f32 1.0, %v2615_v31  ;;  %v1891_v41 = vmul.f32 0.5, %v1875_v22 }
 0x68b   : > { %v2619_v11 = vpop.eup %2618  ;;  %v1935_v5 = vadd.f32 1.0, %v2617_v24  ;;  %v1878_v44 = vadd.f32 %v3629_v32, %v1855_v43 }
 0x68c   : > { %2630 = verf.f32 %v1907_v0  ;;  %v2621_v33 = vpop.eup %2620  ;;  %v1952_v27 = vmul.f32 %v1936_v34, %v1888_v13  ;;  %v1831_v12 = vmul.f32 %v2619_v11, %v3602_v45  ;;  %v1889_v45 = vmul.f32 0.5, %v1873_v42 }
 0x68d   : > { %v1951_v49 = vmul.f32 %v1935_v5, %v1887_v40  ;;  %v1910_v55 = vmul.f32 0.70710677, %v1878_v44  ;;  %v1834_v37 = vmul.f32 %v2621_v33, %v3610_v4  ;;  %v1894_v39 = vmul.f32 0.5, %v1878_v44 }
 0x68e   : > { %1968 = vst [vmem:[%s3674_s15 + $0x38] sm:$0xff] %v1952_v27  ;;  %v1854_v26 = vmul.f32 %v3623_v16, %v1831_v12 }
 0x68f   : > { %1967 = vst [vmem:[%s3674_s15 + $0x30] sm:$0xff] %v1951_v49  ;;  %2632 = verf.f32 %v1910_v55  ;;  %v1857_v36 = vmul.f32 %v3623_v16, %v1834_v37 }
 0x690   : > { %v1877_v3 = vadd.f32 %v3629_v32, %v1854_v26 }
 0x691   : > { %v2623_v50 = vpop.eup %2622  ;;  %v1880_v4 = vadd.f32 %v3629_v32, %v1857_v36 }
 0x692   : > { %v2625_v9 = vpop.eup %2624  ;;  %v1938_v14 = vadd.f32 1.0, %v2623_v50  ;;  %v1909_v52 = vmul.f32 0.70710677, %v1877_v3  ;;  %v1893_v2 = vmul.f32 0.5, %v1877_v3 }
 0x693   : > { %v2627_v59 = vpop.eup %2626  ;;  %v1937_v17 = vadd.f32 1.0, %v2625_v9  ;;  %v1912_v63 = vmul.f32 0.70710677, %v1880_v4  ;;  %v1896_v61 = vmul.f32 0.5, %v1880_v4 }
 0x694   : > { %v2629_v29 = vpop.eup %2628  ;;  %v1954_v8 = vmul.f32 %v1938_v14, %v1890_v46  ;;  %v1940_v20 = vadd.f32 1.0, %v2627_v59  ;;  %2634 = verf.f32 %v1909_v52 }
 0x695   : > { %v1953_v28 = vmul.f32 %v1937_v17, %v1889_v45  ;;  %v1833_v47 = vmul.f32 %v2629_v29, %v3616_v21  ;;  %2636 = verf.f32 %v1912_v63 }
 0x696   : > { %v2631_v18 = vpop.eup %2630  ;;  %1970 = vst [vmem:[%s3674_s15 + $0x48] sm:$0xff] %v1954_v8  ;;  %v1956_v23 = vmul.f32 %v1940_v20, %v1892_v30 }
 0x697   : > { %1969 = vst [vmem:[%s3674_s15 + $0x40] sm:$0xff] %v1953_v28  ;;  %v1939_v35 = vadd.f32 1.0, %v2631_v18  ;;  %v1856_v58 = vmul.f32 %v3623_v16, %v1833_v47 }
 0x698   : > { %1972 = vst [vmem:[%s3674_s15 + $0x58] sm:$0xff] %v1956_v23 }
 0x699   : > { %v1955_v1 = vmul.f32 %v1939_v35, %v1891_v41  ;;  %v1879_v42 = vadd.f32 %v3629_v32, %v1856_v58  ;;  %v2633_v51 = vpop.eup %2632 }
 0x69a   : > { %v1942_v6 = vadd.f32 1.0, %v2633_v51 }
 0x69b   : > { %1971 = vst [vmem:[%s3674_s15 + $0x50] sm:$0xff] %v1955_v1  ;;  %v1911_v21 = vmul.f32 0.70710677, %v1879_v42  ;;  %v1895_v57 = vmul.f32 0.5, %v1879_v42 }
 0x69c   : > { %v1958_v56 = vmul.f32 %v1942_v6, %v1894_v39 }
 0x69d   : > { %2638 = verf.f32 %v1911_v21 }
 0x69e   : > { %v2635_v7 = vpop.eup %2634  ;;  %1974 = vst [vmem:[%s3674_s15 + $0x68] sm:$0xff] %v1958_v56 }
 0x69f   : > { %v2637_v19 = vpop.eup %2636  ;;  %v1941_v16 = vadd.f32 1.0, %v2635_v7 }
 0x6a0   : > { %v1944_v32 = vadd.f32 1.0, %v2637_v19 }
 0x6a1   : > { %v1957_v10 = vmul.f32 %v1941_v16, %v1893_v2 }
 0x6a2   : > { %v1960_v38 = vmul.f32 %v1944_v32, %v1896_v61 }
 0x6a3   : > { %1973 = vst [vmem:[%s3674_s15 + $0x60] sm:$0xff] %v1957_v10 }
 0x6a4   : > { %1976 = vst [vmem:[%s3674_s15 + $0x78] sm:$0xff] %v1960_v38 }
 0x6a7   : > { %v2639_v15 = vpop.eup %2638 }
 0x6a8   : > { %v1943_v53 = vadd.f32 1.0, %v2639_v15 }
 0x6aa   : > { %v1959_v60 = vmul.f32 %v1943_v53, %v1895_v57 }
 0x6ac   : > { %1975 = vst [vmem:[%s3674_s15 + $0x70] sm:$0xff] %v1959_v60 }
 0x6ad   : > { %2653 = shalt.err (!%p2650_p3)
}
 0x6ae   : > { %s2654_s24 = scalar_lea.hbm %s3722_s23, 2048  ;;  %s2658_s22 = scalar_lea.hbm %s3783_s13, 4096 }
 0x6af   : > { %p2655_p4 = scmp.ne.s32.totalorder %s3722_s23, %s2654_s24  ;;  %p2659_p9 = scmp.lt.u32.totalorder %s3722_s23, %s3783_s13 }
 0x6b0   : > { %p2660_p10 = scmp.lt.u32.totalorder %s2658_s22, %s2654_s24  ;;  %p2662_p12 = scmp.lt.u32.totalorder %s2654_s24, %s3722_s23 }
 0x6b1   : > { %p2656_p7 = pnand %p2655_p4, %p2815_p5 }
 0x6b2   : > { %p2661_p11 = por %p2660_p10, %p2659_p9 }
 0x6b3   : > { %p2657_p8 = pneg %p2656_p7 }
 0x6b4   : > { %p2663_p13 = por %p2662_p12, %p2661_p11 }
 0x6b6   : > { %p2664_p0 = pnand %p2663_p13, %p2657_p8 }
 0x6b8   : > { %2667 = shalt.err (!%p2664_p0)
}
 0x6b9   : > { %s2705_s29 = smov 128   ;;  %s2706_s16 = smov 8  }
 0x6ba   : > { %2407 = dma.vmem_to_hbm [thread:$0]  (%p2815_p5), %s3724_s20, 2048, %s3722_s23, %s3729_s17, %s2705_s29, %s2705_s29, %s2706_s16  }
 0x6bb PF: > { %p2413_p1 = scmp.ge.s32.totalorder %s2702_s28, 2  ;;  %s2006_s15 = sand.u32 1, %s2690_s25  }
 0x6bc   : > { %s2007_s24 = scalar_lea.sflag [#allocation3], %s2006_s15 }
 0x6bd   : > { %p2410_p2 = pnand %p2413_p1, %p2819_p6 }
 0x6bf   : > { %2685 = dma.done.wait (!%p2410_p2), %s2007_s24, 2048  }
 0x6c0   : > { %2687 = vsyncadd (!%p2410_p2), %s2007_s24, 4294965248  ;;  %s3789_s21 = sld [smem:[#allocation5_spill]]  ;;  %p23_p3 = scmp.ge.s32.totalorder %s2802_s14, 4  }
 0x6c1   : > { %s3790_s25 = smov %s2694_s26  ;;  %s3791_s26 = smov %s2698_s27 }
 0x6c2   : > { %s3793_s28 = smov %s2802_s14  ;;  %25 = sbr.rel (!%p23_p3) target bundleno = 5 (0x5), region = 107 }
 0x6c6   : > { %s3792_s27 = smov %s3789_s21 }
 0x6c9   :  { %2012 = vsyncpa [#allocation3], 1 }
 0x6ca   :  { %2014 = vsyncpa [#allocation3 + $0x1], 1 }

</bundles_post_ra>
